<compile_context>
chip_gen: v7x
topology: tpu7x:2x2x1
jax: 0.10.0
libtpu: 0.0.40
codegen_flags: <defaults>
</compile_context>

<pallas_src>
import functools
import itertools

import numpy as np
import jax
import jax.numpy as jnp
from jax import lax
from jax.experimental import pallas as pl
from jax.experimental.pallas import tpu as pltpu

try:  # proper Hungarian solver if available; brute force fallback for tiny cases
    from scipy.optimize import linear_sum_assignment as _scipy_lsa
except Exception:  # pragma: no cover
    _scipy_lsa = None

# ----------------------------------------------------------------------------
# matcher cost weights (module __init__ defaults)
# ----------------------------------------------------------------------------
COST_OBJ = 1.0
COST_CTR = 1.0
COST_END = 1.0
COST_MASK = 1.0
COST_CURVE = 1.0
COST_RECOVERY = 1.0

_GT_LANE = 128  # pad GT to the 128-lane vreg width (lane-dense output stores)


def _round_up(x, m):
    return ((x + m - 1) // m) * m


# ----------------------------------------------------------------------------
# generation-aware VMEM budgets / tile caps
# ----------------------------------------------------------------------------
def _chip_vmem_bytes():
    try:
        info = pltpu.get_tpu_info()
        for attr in ("vmem_capacity_bytes", "vmem_bytes", "vmem_size_bytes"):
            v = getattr(info, attr, None)
            if v:
                return int(v)
    except Exception:
        pass
    return 64 * 1024 * 1024  # conservative default (v7x per-TC VMEM)


_VMEM_CAP = _chip_vmem_bytes()
_BIG_VMEM = _VMEM_CAP >= 96 * 1024 * 1024          # v5e / v6e (128 MiB physical)
_VMEM_LIMIT = (100 * 1024 * 1024) if _BIG_VMEM else (56 * 1024 * 1024)
_VMEM_BUDGET = (80 * 1024 * 1024) if _BIG_VMEM else (40 * 1024 * 1024)
_TILE_DT_MAX = 1024 if _BIG_VMEM else 256
_LIKELY_TWO_TC = not _BIG_VMEM                      # 64-MiB-VMEM chip => v7x (2 TCs)


def _pick_tile_dt(dt_num, hw, gt_pad, c_total, d_total, num_pairs):
    """Largest DT tile whose working set fits the VMEM budget.

    dt-side blocks + output are double-buffered (2x); gt-side blocks have a
    constant index_map along the DT axis and are charged once.
    """
    cd = c_total + d_total
    d_sub = _round_up(d_total, 8)

    def est(t):
        dt_side = t * (4 * cd + 2 * hw + 2 * hw) + t * gt_pad * 4            # in + out
        gt_side = gt_pad * (4 * c_total + 4 * d_total + 2 * hw + 4 * 8)      # resident
        interm = (2 * t * d_sub * gt_pad * 4      # |pts - gt| 3-D broadcast diff
                  + t * hw * 4                    # sigmoid(p) in f32
                  + 6 * t * gt_pad * 4)           # cost tiles / matmul results
        return 2 * dt_side + gt_side + interm

    tile = min(_TILE_DT_MAX, _round_up(max(dt_num, 1), 16))
    while tile > 16 and est(tile) > _VMEM_BUDGET:
        tile = _round_up(tile // 2, 16)
    # v7x: if there is only one pair, make sure the DT axis has >=2 steps so the
    # "parallel" grid can be sharded across both TensorCores.
    if _LIKELY_TWO_TC and num_pairs < 2 and dt_num > 16:
        tile = min(tile, _round_up((dt_num + 1) // 2, 16))
    return max(tile, 16)


# ----------------------------------------------------------------------------
# Pallas kernel: one fused cost-matrix tile (pair p, dt-tile i)
# ----------------------------------------------------------------------------
def _cost_matrix_kernel(dt_feat_ref, dt_mask_ref, dt_hist_ref,
                        oh_t_ref, gt_pts_t_ref, gt_mask_t_ref, gsum_ref,
                        c_ref, *, n_obj_cls, c_total, inv_n_pts):
    f32 = jnp.float32

    # --- classification costs: segment-wise softmax (obj | end) + one matmul -
    logits = dt_feat_ref[:, :c_total].astype(f32)               # (T, C_obj+C_end)
    col = lax.broadcasted_iota(jnp.int32, logits.shape, 1)
    is_obj = col < n_obj_cls
    m_obj = jnp.max(jnp.where(is_obj, logits, -jnp.inf), axis=-1, keepdims=True)
    m_end = jnp.max(jnp.where(is_obj, -jnp.inf, logits), axis=-1, keepdims=True)
    e = jnp.exp(logits - jnp.where(is_obj, m_obj, m_end))
    s_obj = jnp.sum(jnp.where(is_obj, e, 0.0), axis=-1, keepdims=True)
    s_end = jnp.sum(jnp.where(is_obj, 0.0, e), axis=-1, keepdims=True)
    probs = e / jnp.where(is_obj, s_obj, s_end)                 # exact divide
    # one-hot columns pre-weighted by COST_OBJ / COST_END in the wrapper
    cost_cls = -lax.dot_general(probs, oh_t_ref[...].astype(f32),
                                (((1,), (0,)), ((), ())),
                                preferred_element_type=f32)     # (T, GT)

    # --- merged L1 cdist costs (ctr | curve); columns pre-scaled by w/dim ----
    # broadcasted (T, D, GT) diff, reduce D on the sublane axis (no per-column
    # lane extraction / 26 live temporaries)
    pts = dt_feat_ref[:, c_total:].astype(f32)                  # (T, D_total)
    bt = gt_pts_t_ref[...].astype(f32)                          # (D_total, GT)
    cost_pts = jnp.sum(jnp.abs(pts[:, :, None] - bt[None, :, :]), axis=1)

    # --- dice mask cost + point-recovery cost: two matmuls, one shared RHS ---
    # TODO(synk): SegmentationLoss / PointRecoveryLoss configs are not provided
    #             in the reference; dice matcher cost and nearest-pixel miss
    #             rate are used as stand-ins.
    g_t = gt_mask_t_ref[...]                                    # (HW, GT) bf16
    p = jax.nn.sigmoid(dt_mask_ref[...].astype(f32))            # (T, HW) f32
    psum = jnp.sum(p, axis=-1, keepdims=True)                   # (T, 1)
    inter = lax.dot_general(p.astype(jnp.bfloat16), g_t,
                            (((1,), (0,)), ((), ())),
                            preferred_element_type=f32)         # sigmoid(mask) @ gt
    hist_g = lax.dot_general(dt_hist_ref[...], g_t,
                             (((1,), (0,)), ((), ())),
                             preferred_element_type=f32)        # point counts @ gt
    gsum = gsum_ref[...]                                        # (1, GT) f32, hoisted
    cost_mask = 1.0 - (2.0 * inter + 1.0) / (psum + gsum + 1.0)
    cost_rec = 1.0 - hist_g * inv_n_pts                         # exact counts / n_pts

    c_ref[...] = (cost_cls + cost_pts
                  + COST_MASK * cost_mask
                  + COST_RECOVERY * cost_rec).astype(c_ref.dtype)


def compute_cost_matrices(dt_feat, dt_mask, dt_hist, oh_t, gt_pts_t, gt_mask_t,
                          gsum, *, n_obj_cls, c_total, n_pts, tile_dt):
    """One pallas_call covering all pairs of one shape group.

    dt_feat:   (P, dt_pad, C+D) f32      dt_mask/dt_hist: (P, dt_pad, HW) bf16
    oh_t:      (P, C, gt_pad) f32        gt_pts_t: (P, D, gt_pad) f32
    gt_mask_t: (P, HW, gt_pad) bf16      gsum: (P, 1, gt_pad) f32
    returns    (P, dt_pad, gt_pad) f32 padded cost matrices.
    """
    P, dt_pad, cd_total = dt_feat.shape
    hw = dt_mask.shape[-1]
    d_total = gt_pts_t.shape[1]
    gt_pad = oh_t.shape[-1]
    grid = (P, dt_pad // tile_dt)
    kernel = functools.partial(_cost_matrix_kernel, n_obj_cls=n_obj_cls,
                               c_total=c_total, inv_n_pts=1.0 / float(n_pts))
    return pl.pallas_call(
        kernel,
        out_shape=jax.ShapeDtypeStruct((P, dt_pad, gt_pad), jnp.float32),
        grid_spec=pltpu.PrefetchScalarGridSpec(
            num_scalar_prefetch=0,
            grid=grid,
            in_specs=[
                # dt-side (varies with both grid axes; double-buffered)
                pl.BlockSpec((None, tile_dt, cd_total), lambda p, i: (p, i, 0)),
                pl.BlockSpec((None, tile_dt, hw), lambda p, i: (p, i, 0)),
                pl.BlockSpec((None, tile_dt, hw), lambda p, i: (p, i, 0)),
                # gt-side (constant along the DT axis; resident per pair)
                pl.BlockSpec((None, c_total, gt_pad), lambda p, i: (p, 0, 0)),
                pl.BlockSpec((None, d_total, gt_pad), lambda p, i: (p, 0, 0)),
                pl.BlockSpec((None, hw, gt_pad), lambda p, i: (p, 0, 0)),
                pl.BlockSpec((None, 1, gt_pad), lambda p, i: (p, 0, 0)),
            ],
            out_specs=pl.BlockSpec((None, tile_dt, gt_pad), lambda p, i: (p, i, 0)),
        ),
        compiler_params=pltpu.CompilerParams(
            dimension_semantics=("parallel", "parallel"),
            vmem_limit_bytes=_VMEM_LIMIT),
    )(dt_feat, dt_mask, dt_hist, oh_t, gt_pts_t, gt_mask_t, gsum)


# ----------------------------------------------------------------------------
# Host-side linear-sum-assignment.
# TODO(synk): scipy.optimize.linear_sum_assignment has no Pallas equivalent
#             (sequential, data-dependent) — solved on host.
# ----------------------------------------------------------------------------
def _linear_sum_assignment(cost):
    nr, nc = cost.shape
    if nc == 0:
        return np.zeros(0, np.int32), np.zeros(0, np.int32)
    if _scipy_lsa is not None:
        r, c = _scipy_lsa(cost)
        return np.asarray(r, np.int32), np.asarray(c, np.int32)
    # brute-force fallback (fine for the tiny synthetic example)
    assert nr >= nc, "expected num_queries >= num_gts"
    best_sum, best_perm = None, None
    for perm in itertools.permutations(range(nr), nc):
        s = sum(cost[perm[j], j] for j in range(nc))
        if best_sum is None or s < best_sum:
            best_sum, best_perm = s, perm
    pairs = sorted(zip(best_perm, range(nc)))
    rows = np.array([p[0] for p in pairs], dtype=np.int32)
    cols = np.array([p[1] for p in pairs], dtype=np.int32)
    return rows, cols


def _to_tensor(i, j):
    # torch int64 -> int32 here (JAX default x64 disabled)
    return (jnp.asarray(i, dtype=jnp.int32), jnp.asarray(j, dtype=jnp.int32))


def _pad2d(x, rows, cols):
    pr, pc = rows - x.shape[0], cols - x.shape[1]
    if pr or pc:
        x = jnp.pad(x, ((0, pr), (0, pc)))
    return x


# ----------------------------------------------------------------------------
# HungarianMatcher.forward equivalent
# ----------------------------------------------------------------------------
def hungarian_matcher_forward(outputs, targets, class_weight=None):
    num_decoders = len(outputs['ins_masks'])
    num_classes = len(outputs['ins_masks'][0])
    matching_indices = [[[] for _ in range(num_classes)] for _ in range(num_decoders)]

    # ---- phase 1: build per-pair slabs and group pairs by shape signature ----
    groups = {}
    for dec_id in range(num_decoders):
        for cid in range(num_classes):
            if class_weight is not None and class_weight[cid] == 0:
                continue

            obj_logits = outputs['obj_logits'][dec_id][cid]
            bs, num_queries = obj_logits.shape[:2]
            dt_num = bs * num_queries

            sizes = [int(t['obj_labels'][cid].shape[0]) for t in targets]
            gt_num = int(np.sum(sizes))
            if gt_num == 0:
                matching_indices[dec_id][cid] = [
                    _to_tensor(np.zeros(0, np.int32), np.zeros(0, np.int32))
                    for _ in targets]
                continue

            # ------ detections ------
            dt_obj_logits = obj_logits.reshape(dt_num, -1).astype(jnp.float32)
            dt_end_logits = outputs['end_logits'][dec_id][cid].reshape(dt_num, -1).astype(jnp.float32)
            n_obj_cls = dt_obj_logits.shape[-1]
            n_end_cls = dt_end_logits.shape[-1]

            dt_ctrs = outputs['ctr_points'][dec_id][cid].reshape(dt_num, -1).astype(jnp.float32)
            dt_curve_pts = outputs['curve_points'][dec_id][cid].reshape(dt_num, -1, 2)
            dt_curves = dt_curve_pts.reshape(dt_num, -1).astype(jnp.float32)
            d_ctr, d_cur = dt_ctrs.shape[1], dt_curves.shape[1]
            # one fused slab: [obj logits | end logits | scaled ctr | scaled curve]
            # point columns pre-scaled so a single |.| accumulation yields
            #   COST_CTR * cdist(ctr)/d_ctr + COST_CURVE * cdist(curve)/d_cur
            dt_feat = jnp.concatenate(
                [dt_obj_logits, dt_end_logits,
                 dt_ctrs * (COST_CTR / d_ctr),
                 dt_curves * (COST_CURVE / d_cur)], axis=-1)

            ins_masks = outputs['ins_masks'][dec_id][cid]
            H, W = ins_masks.shape[-2:]
            HW = H * W
            dt_masks = ins_masks.reshape(dt_num, HW)

            # curve-point pixel histogram via scatter-add (integer counts, exact
            # in bf16; division by n_pts happens in-kernel in f32)
            n_pts = dt_curve_pts.shape[1]
            ix = jnp.clip(jnp.floor(dt_curve_pts[..., 0] * W).astype(jnp.int32), 0, W - 1)
            iy = jnp.clip(jnp.floor(dt_curve_pts[..., 1] * H).astype(jnp.int32), 0, H - 1)
            flat_idx = iy * W + ix                                      # (DT, n_pts)
            rows = jnp.broadcast_to(jnp.arange(dt_num)[:, None], flat_idx.shape)
            dt_hist = jnp.zeros((dt_num, HW), jnp.float32).at[rows, flat_idx].add(1.0)

            # ------ targets (concat over batch) ------
            gt_idxes = jnp.concatenate([t['obj_labels'][cid] for t in targets])
            gt_end_idxes = jnp.concatenate([t['end_labels'][cid] for t in targets])
            gt_ctrs = jnp.concatenate(
                [t['ctr_points'][cid] for t in targets]).reshape(gt_num, -1).astype(jnp.float32)
            gt_curves = jnp.concatenate(
                [t['curve_points'][cid] for t in targets]).reshape(gt_num, -1).astype(jnp.float32)
            gt_masks = jnp.concatenate(
                [t['ins_masks'][cid] for t in targets]).reshape(gt_num, HW).astype(jnp.float32)

            obj_oh = jax.nn.one_hot(gt_idxes, n_obj_cls, dtype=jnp.float32) * COST_OBJ
            end_oh = jax.nn.one_hot(gt_end_idxes, n_end_cls, dtype=jnp.float32) * COST_END
            oh_t = jnp.concatenate([obj_oh, end_oh], axis=-1).T          # (C_total, GT)
            gt_pts_t = jnp.concatenate([gt_ctrs * (COST_CTR / d_ctr),
                                        gt_curves * (COST_CURVE / d_cur)], axis=-1).T
            gt_mask_t = gt_masks.T                                       # (HW, GT)
            gsum = jnp.sum(gt_masks, axis=-1)[None, :]                   # (1, GT) hoisted

            key = (dt_num, n_obj_cls, n_end_cls, d_ctr, d_cur, HW, n_pts)
            grp = groups.setdefault(key, dict(entries=[], dt_feat=[], dt_mask=[],
                                              dt_hist=[], oh_t=[], gt_pts_t=[],
                                              gt_mask_t=[], gsum=[]))
            grp['entries'].append(dict(dec=dec_id, cid=cid, bs=bs, nq=num_queries,
                                       dt_num=dt_num, gt_num=gt_num, sizes=sizes))
            grp['dt_feat'].append(dt_feat)
            grp['dt_mask'].append(dt_masks)
            grp['dt_hist'].append(dt_hist)
            grp['oh_t'].append(oh_t)
            grp['gt_pts_t'].append(gt_pts_t)
            grp['gt_mask_t'].append(gt_mask_t)
            grp['gsum'].append(gsum)

    # ---- phase 2: one batched pallas_call per shape group ----
    launched = []
    for key, grp in groups.items():
        dt_num, n_obj_cls, n_end_cls, d_ctr, d_cur, HW, n_pts = key
        c_total = n_obj_cls + n_end_cls
        d_total = d_ctr + d_cur
        P = len(grp['entries'])
        gt_pad = _round_up(max(e['gt_num'] for e in grp['entries']), _GT_LANE)
        tile_dt = _pick_tile_dt(dt_num, HW, gt_pad, c_total, d_total, P)
        dt_pad = _round_up(dt_num, tile_dt)

        dt_feat = jnp.stack([_pad2d(x, dt_pad, c_total + d_total) for x in grp['dt_feat']])
        dt_mask = jnp.stack([_pad2d(x, dt_pad, HW) for x in grp['dt_mask']]).astype(jnp.bfloat16)
        dt_hist = jnp.stack([_pad2d(x, dt_pad, HW) for x in grp['dt_hist']]).astype(jnp.bfloat16)
        oh_t = jnp.stack([_pad2d(x, c_total, gt_pad) for x in grp['oh_t']])
        gt_pts_t = jnp.stack([_pad2d(x, d_total, gt_pad) for x in grp['gt_pts_t']])
        gt_mask_t = jnp.stack([_pad2d(x, HW, gt_pad) for x in grp['gt_mask_t']]).astype(jnp.bfloat16)
        gsum = jnp.stack([_pad2d(x, 1, gt_pad) for x in grp['gsum']])

        C_pad = compute_cost_matrices(dt_feat, dt_mask, dt_hist, oh_t, gt_pts_t,
                                      gt_mask_t, gsum, n_obj_cls=n_obj_cls,
                                      c_total=c_total, n_pts=n_pts, tile_dt=tile_dt)
        launched.append((grp['entries'], C_pad))

    # ---- phase 3: one bulk D2H transfer, slice padding in numpy, host LSA ----
    host_mats = jax.device_get([c for _, c in launched])
    for (entries, _), C_host in zip(launched, host_mats):
        C_all = np.asarray(C_host)
        for slot, e in enumerate(entries):
            # padded DT rows / GT cols carry garbage costs; must slice before LSA
            C_np = C_all[slot, :e['dt_num'], :e['gt_num']].reshape(
                e['bs'], e['nq'], e['gt_num'])
            splits = np.cumsum(e['sizes'])[:-1]
            chunks = np.split(C_np, splits, axis=-1)
            indices = [_linear_sum_assignment(chunks[i][i]) for i in range(e['bs'])]
            matching_indices[e['dec']][e['cid']] = [_to_tensor(i, j) for i, j in indices]

    return matching_indices


# ----------------------------------------------------------------------------
# deterministic synthetic example
# ----------------------------------------------------------------------------
def _make_example():
    key = jax.random.PRNGKey(0)
    num_decoders, num_classes = 1, 2
    bs, nq = 2, 8
    n_obj_cls, n_end_cls = 2, 3
    n_ctr, n_pts = 3, 10
    H = W = 16
    gt_sizes = [[3, 2], [2, 3]]  # [sample][class]

    def nxt():
        nonlocal key
        key, sub = jax.random.split(key)
        return sub

    outputs = {
        'obj_logits': [[jax.random.normal(nxt(), (bs, nq, n_obj_cls), jnp.float32)
                        for _ in range(num_classes)] for _ in range(num_decoders)],
        'end_logits': [[jax.random.normal(nxt(), (bs, nq, n_end_cls), jnp.float32)
                        for _ in range(num_classes)] for _ in range(num_decoders)],
        'ctr_points': [[jax.random.uniform(nxt(), (bs, nq, n_ctr, 2), jnp.float32)
                        for _ in range(num_classes)] for _ in range(num_decoders)],
        'curve_points': [[jax.random.uniform(nxt(), (bs, nq, n_pts, 2), jnp.float32)
                          for _ in range(num_classes)] for _ in range(num_decoders)],
        'ins_masks': [[jax.random.normal(nxt(), (bs, nq, H, W), jnp.float32)
                       for _ in range(num_classes)] for _ in range(num_decoders)],
    }

    targets = []
    for b in range(bs):
        tgt = {'obj_labels': [], 'end_labels': [], 'ctr_points': [],
               'curve_points': [], 'ins_masks': []}
        for c in range(num_classes):
            n = gt_sizes[b][c]
            tgt['obj_labels'].append(
                jax.random.randint(nxt(), (n,), 0, n_obj_cls, jnp.int32))
            tgt['end_labels'].append(
                jax.random.randint(nxt(), (n,), 0, n_end_cls, jnp.int32))
            tgt['ctr_points'].append(
                jax.random.uniform(nxt(), (n, n_ctr, 2), jnp.float32))
            tgt['curve_points'].append(
                jax.random.uniform(nxt(), (n, n_pts, 2), jnp.float32))
            tgt['ins_masks'].append(
                (jax.random.uniform(nxt(), (n, H, W), jnp.float32) > 0.5
                 ).astype(jnp.float32))
        targets.append(tgt)

    return outputs, targets


if __name__ == "__main__":
    outputs, targets = _make_example()
    matching_indices = hungarian_matcher_forward(outputs, targets, class_weight=None)
    # block on all returned index tensors
    for dec in matching_indices:
        for cls_list in dec:
            for i, j in cls_list:
                jax.block_until_ready(i)
                jax.block_until_ready(j)
    print("KERNEL_OK")
</pallas_src>

<mosaic_0001>
module attributes {stable_mosaic.version = 11 : i64} {
  func.func @_cost_matrix_kernel(%arg0: i32, %arg1: i32, %arg2: memref<1x16x31xf32, #tpu.memory_space<vmem>>, %arg3: memref<1x16x256xbf16, #tpu.memory_space<vmem>>, %arg4: memref<1x16x256xbf16, #tpu.memory_space<vmem>>, %arg5: memref<1x5x128xf32, #tpu.memory_space<vmem>>, %arg6: memref<1x26x128xf32, #tpu.memory_space<vmem>>, %arg7: memref<1x256x128xbf16, #tpu.memory_space<vmem>>, %arg8: memref<1x1x128xf32, #tpu.memory_space<vmem>>, %arg9: memref<1x16x128xf32, #tpu.memory_space<vmem>>) attributes {dimension_semantics = [#tpu.dimension_semantics<parallel>, #tpu.dimension_semantics<parallel>], iteration_bounds = array<i64: 2, 1>, scalar_prefetch = 0 : i64, scratch_operands = 0 : i64, tpu.core_type = #tpu.core_type<tc>, window_params = [{transform_indices = @transform_0, window_bounds = array<i64: 1, 16, 31>}, {transform_indices = @transform_1, window_bounds = array<i64: 1, 16, 256>}, {transform_indices = @transform_2, window_bounds = array<i64: 1, 16, 256>}, {transform_indices = @transform_3, window_bounds = array<i64: 1, 5, 128>}, {transform_indices = @transform_4, window_bounds = array<i64: 1, 26, 128>}, {transform_indices = @transform_5, window_bounds = array<i64: 1, 256, 128>}, {transform_indices = @transform_6, window_bounds = array<i64: 1, 1, 128>}, {transform_indices = @transform_7, window_bounds = array<i64: 1, 16, 128>}]} {
    %c0 = arith.constant 0 : index
    %c0_0 = arith.constant 0 : index
    %c0_1 = arith.constant 0 : index
    %0 = vector.load %arg2[%c0, %c0_0, %c0_1] : memref<1x16x31xf32, #tpu.memory_space<vmem>>, vector<1x16x5xf32>
    %1 = vector.shape_cast %0 : vector<1x16x5xf32> to vector<16x5xf32>
    %2 = tpu.iota {dimensions = array<i32: 1>} : vector<16x5xi32>
    %c2_i32 = arith.constant 2 : i32
    %3 = vector.broadcast %c2_i32 : i32 to vector<16x5xi32>
    %4 = arith.cmpi slt, %2, %3 : vector<16x5xi32>
    %cst = arith.constant 0xFF800000 : f32
    %5 = vector.broadcast %cst : f32 to vector<16x5xf32>
    %6 = arith.select %4, %1, %5 : vector<16x5xi1>, vector<16x5xf32>
    %cst_2 = arith.constant dense<0xFF800000> : vector<16xf32>
    %7 = vector.multi_reduction <maximumf>, %6, %cst_2 [1] : vector<16x5xf32> to vector<16xf32>
    %8 = vector.shape_cast %7 : vector<16xf32> to vector<16x1xf32>
    %cst_3 = arith.constant 0xFF800000 : f32
    %9 = vector.broadcast %cst_3 : f32 to vector<16x5xf32>
    %10 = arith.select %4, %9, %1 : vector<16x5xi1>, vector<16x5xf32>
    %cst_4 = arith.constant dense<0xFF800000> : vector<16xf32>
    %11 = vector.multi_reduction <maximumf>, %10, %cst_4 [1] : vector<16x5xf32> to vector<16xf32>
    %12 = vector.shape_cast %11 : vector<16xf32> to vector<16x1xf32>
    %13 = vector.shape_cast %8 : vector<16x1xf32> to vector<16x1xf32>
    %14 = vector.broadcast %13 : vector<16x1xf32> to vector<16x5xf32>
    %15 = vector.shape_cast %12 : vector<16x1xf32> to vector<16x1xf32>
    %16 = vector.broadcast %15 : vector<16x1xf32> to vector<16x5xf32>
    %17 = arith.select %4, %14, %16 : vector<16x5xi1>, vector<16x5xf32>
    %18 = arith.subf %1, %17 : vector<16x5xf32>
    %19 = math.exp %18 : vector<16x5xf32>
    %cst_5 = arith.constant 0.000000e+00 : f32
    %20 = vector.broadcast %cst_5 : f32 to vector<16x5xf32>
    %21 = arith.select %4, %19, %20 : vector<16x5xi1>, vector<16x5xf32>
    %cst_6 = arith.constant dense<0.000000e+00> : vector<16xf32>
    %22 = vector.multi_reduction <add>, %21, %cst_6 [1] : vector<16x5xf32> to vector<16xf32>
    %23 = vector.shape_cast %22 : vector<16xf32> to vector<16x1xf32>
    %cst_7 = arith.constant 0.000000e+00 : f32
    %24 = vector.broadcast %cst_7 : f32 to vector<16x5xf32>
    %25 = arith.select %4, %24, %19 : vector<16x5xi1>, vector<16x5xf32>
    %cst_8 = arith.constant dense<0.000000e+00> : vector<16xf32>
    %26 = vector.multi_reduction <add>, %25, %cst_8 [1] : vector<16x5xf32> to vector<16xf32>
    %27 = vector.shape_cast %26 : vector<16xf32> to vector<16x1xf32>
    %28 = vector.shape_cast %23 : vector<16x1xf32> to vector<16x1xf32>
    %29 = vector.broadcast %28 : vector<16x1xf32> to vector<16x5xf32>
    %30 = vector.shape_cast %27 : vector<16x1xf32> to vector<16x1xf32>
    %31 = vector.broadcast %30 : vector<16x1xf32> to vector<16x5xf32>
    %32 = arith.select %4, %29, %31 : vector<16x5xi1>, vector<16x5xf32>
    %33 = arith.divf %19, %32 : vector<16x5xf32>
    %c0_9 = arith.constant 0 : index
    %c0_10 = arith.constant 0 : index
    %c0_11 = arith.constant 0 : index
    %34 = vector.load %arg5[%c0_9, %c0_10, %c0_11] : memref<1x5x128xf32, #tpu.memory_space<vmem>>, vector<1x5x128xf32>
    %35 = vector.shape_cast %34 : vector<1x5x128xf32> to vector<5x128xf32>
    %cst_12 = arith.constant dense<0.000000e+00> : vector<16x128xf32>
    %36 = tpu.matmul %33, %35, %cst_12 {dimension_numbers = #tpu.dot_dimension_numbers<[1], [0], [0], [1], [0, 0, 1, 1], [], []>} : vector<16x5xf32>, vector<5x128xf32>, vector<16x128xf32> -> vector<16x128xf32>
    %cst_13 = arith.constant 0.000000e+00 : f32
    %37 = vector.broadcast %cst_13 : f32 to vector<16x128xf32>
    %38 = arith.subf %37, %36 : vector<16x128xf32>
    %c0_14 = arith.constant 0 : index
    %c0_15 = arith.constant 0 : index
    %c5 = arith.constant 5 : index
    %39 = vector.load %arg2[%c0_14, %c0_15, %c5] : memref<1x16x31xf32, #tpu.memory_space<vmem>>, vector<1x16x26xf32>
    %40 = vector.shape_cast %39 : vector<1x16x26xf32> to vector<16x26xf32>
    %c0_16 = arith.constant 0 : index
    %c0_17 = arith.constant 0 : index
    %c0_18 = arith.constant 0 : index
    %41 = vector.load %arg6[%c0_16, %c0_17, %c0_18] : memref<1x26x128xf32, #tpu.memory_space<vmem>>, vector<1x26x128xf32>
    %42 = vector.shape_cast %41 : vector<1x26x128xf32> to vector<26x128xf32>
    %43 = vector.shape_cast %40 : vector<16x26xf32> to vector<16x26x1xf32>
    %44 = vector.shape_cast %42 : vector<26x128xf32> to vector<1x26x128xf32>
    %45 = vector.broadcast %43 : vector<16x26x1xf32> to vector<16x26x128xf32>
    %46 = vector.broadcast %44 : vector<1x26x128xf32> to vector<16x26x128xf32>
    %47 = arith.subf %45, %46 : vector<16x26x128xf32>
    %48 = math.absf %47 : vector<16x26x128xf32>
    %cst_19 = arith.constant dense<0.000000e+00> : vector<16x128xf32>
    %49 = vector.multi_reduction <add>, %48, %cst_19 [1] : vector<16x26x128xf32> to vector<16x128xf32>
    %c0_20 = arith.constant 0 : index
    %c0_21 = arith.constant 0 : index
    %c0_22 = arith.constant 0 : index
    %50 = vector.load %arg7[%c0_20, %c0_21, %c0_22] : memref<1x256x128xbf16, #tpu.memory_space<vmem>>, vector<1x256x128xbf16>
    %51 = vector.shape_cast %50 : vector<1x256x128xbf16> to vector<256x128xbf16>
    %c0_23 = arith.constant 0 : index
    %c0_24 = arith.constant 0 : index
    %c0_25 = arith.constant 0 : index
    %52 = vector.load %arg3[%c0_23, %c0_24, %c0_25] : memref<1x16x256xbf16, #tpu.memory_space<vmem>>, vector<1x16x256xbf16>
    %53 = vector.shape_cast %52 : vector<1x16x256xbf16> to vector<16x256xbf16>
    %54 = arith.extf %53 : vector<16x256xbf16> to vector<16x256xf32>
    %55 = arith.negf %54 : vector<16x256xf32>
    %56 = math.exp %55 : vector<16x256xf32>
    %cst_26 = arith.constant 1.000000e+00 : f32
    %57 = vector.broadcast %cst_26 : f32 to vector<16x256xf32>
    %58 = arith.addf %57, %56 : vector<16x256xf32>
    %59 = arith.divf %57, %58 : vector<16x256xf32>
    %cst_27 = arith.constant dense<0.000000e+00> : vector<16xf32>
    %60 = vector.multi_reduction <add>, %59, %cst_27 [1] : vector<16x256xf32> to vector<16xf32>
    %61 = vector.shape_cast %60 : vector<16xf32> to vector<16x1xf32>
    %62 = arith.truncf %59 : vector<16x256xf32> to vector<16x256xbf16>
    %cst_28 = arith.constant dense<0.000000e+00> : vector<16x128xf32>
    %63 = tpu.matmul %62, %51, %cst_28 {dimension_numbers = #tpu.dot_dimension_numbers<[1], [0], [0], [1], [0, 0, 1, 1], [], []>} : vector<16x256xbf16>, vector<256x128xbf16>, vector<16x128xf32> -> vector<16x128xf32>
    %c0_29 = arith.constant 0 : index
    %c0_30 = arith.constant 0 : index
    %c0_31 = arith.constant 0 : index
    %64 = vector.load %arg4[%c0_29, %c0_30, %c0_31] : memref<1x16x256xbf16, #tpu.memory_space<vmem>>, vector<1x16x256xbf16>
    %65 = vector.shape_cast %64 : vector<1x16x256xbf16> to vector<16x256xbf16>
    %cst_32 = arith.constant dense<0.000000e+00> : vector<16x128xf32>
    %66 = tpu.matmul %65, %51, %cst_32 {dimension_numbers = #tpu.dot_dimension_numbers<[1], [0], [0], [1], [0, 0, 1, 1], [], []>} : vector<16x256xbf16>, vector<256x128xbf16>, vector<16x128xf32> -> vector<16x128xf32>
    %c0_33 = arith.constant 0 : index
    %c0_34 = arith.constant 0 : index
    %c0_35 = arith.constant 0 : index
    %67 = vector.load %arg8[%c0_33, %c0_34, %c0_35] : memref<1x1x128xf32, #tpu.memory_space<vmem>>, vector<1x1x128xf32>
    %68 = vector.shape_cast %67 : vector<1x1x128xf32> to vector<1x128xf32>
    %cst_36 = arith.constant 2.000000e+00 : f32
    %69 = vector.broadcast %cst_36 : f32 to vector<16x128xf32>
    %70 = arith.mulf %69, %63 : vector<16x128xf32>
    %cst_37 = arith.constant 1.000000e+00 : f32
    %71 = vector.broadcast %cst_37 : f32 to vector<16x128xf32>
    %72 = arith.addf %70, %71 : vector<16x128xf32>
    %73 = vector.broadcast %61 : vector<16x1xf32> to vector<16x128xf32>
    %74 = vector.broadcast %68 : vector<1x128xf32> to vector<16x128xf32>
    %75 = arith.addf %73, %74 : vector<16x128xf32>
    %cst_38 = arith.constant 1.000000e+00 : f32
    %76 = vector.broadcast %cst_38 : f32 to vector<16x128xf32>
    %77 = arith.addf %75, %76 : vector<16x128xf32>
    %78 = arith.divf %72, %77 : vector<16x128xf32>
    %cst_39 = arith.constant 1.000000e+00 : f32
    %79 = vector.broadcast %cst_39 : f32 to vector<16x128xf32>
    %80 = arith.subf %79, %78 : vector<16x128xf32>
    %cst_40 = arith.constant 1.000000e-01 : f32
    %81 = vector.broadcast %cst_40 : f32 to vector<16x128xf32>
    %82 = arith.mulf %66, %81 : vector<16x128xf32>
    %cst_41 = arith.constant 1.000000e+00 : f32
    %83 = vector.broadcast %cst_41 : f32 to vector<16x128xf32>
    %84 = arith.subf %83, %82 : vector<16x128xf32>
    %85 = arith.addf %38, %49 : vector<16x128xf32>
    %cst_42 = arith.constant 1.000000e+00 : f32
    %86 = vector.broadcast %cst_42 : f32 to vector<16x128xf32>
    %87 = arith.mulf %86, %80 : vector<16x128xf32>
    %88 = arith.addf %85, %87 : vector<16x128xf32>
    %cst_43 = arith.constant 1.000000e+00 : f32
    %89 = vector.broadcast %cst_43 : f32 to vector<16x128xf32>
    %90 = arith.mulf %89, %84 : vector<16x128xf32>
    %91 = arith.addf %88, %90 : vector<16x128xf32>
    %c0_44 = arith.constant 0 : index
    %c0_45 = arith.constant 0 : index
    %c0_46 = arith.constant 0 : index
    %92 = vector.load %arg9[%c0_44, %c0_45, %c0_46] : memref<1x16x128xf32, #tpu.memory_space<vmem>>, vector<1x16x128xf32>
    %93 = vector.shape_cast %92 : vector<1x16x128xf32> to vector<16x128xf32>
    %94 = vector.shape_cast %91 : vector<16x128xf32> to vector<1x16x128xf32>
    tpu.vector_store %arg9[%c0_44, %c0_45, %c0_46], %94 {strides = array<i32>} : memref<1x16x128xf32, #tpu.memory_space<vmem>>, vector<1x16x128xf32>,
    return
  }
  func.func @transform_0(%arg0: i32, %arg1: i32) -> (i32, i32, i32) {
    %c0_i32 = arith.constant 0 : i32
    %c0_i32_0 = arith.constant 0 : i32
    return %arg0, %arg1, %c0_i32 : i32, i32, i32
  }
  func.func @transform_1(%arg0: i32, %arg1: i32) -> (i32, i32, i32) {
    %c0_i32 = arith.constant 0 : i32
    %c0_i32_0 = arith.constant 0 : i32
    return %arg0, %arg1, %c0_i32 : i32, i32, i32
  }
  func.func @transform_2(%arg0: i32, %arg1: i32) -> (i32, i32, i32) {
    %c0_i32 = arith.constant 0 : i32
    %c0_i32_0 = arith.constant 0 : i32
    return %arg0, %arg1, %c0_i32 : i32, i32, i32
  }
  func.func @transform_3(%arg0: i32, %arg1: i32) -> (i32, i32, i32) {
    %c0_i32 = arith.constant 0 : i32
    %c0_i32_0 = arith.constant 0 : i32
    %c0_i32_1 = arith.constant 0 : i32
    return %arg0, %c0_i32, %c0_i32_0 : i32, i32, i32
  }
  func.func @transform_4(%arg0: i32, %arg1: i32) -> (i32, i32, i32) {
    %c0_i32 = arith.constant 0 : i32
    %c0_i32_0 = arith.constant 0 : i32
    %c0_i32_1 = arith.constant 0 : i32
    return %arg0, %c0_i32, %c0_i32_0 : i32, i32, i32
  }
  func.func @transform_5(%arg0: i32, %arg1: i32) -> (i32, i32, i32) {
    %c0_i32 = arith.constant 0 : i32
    %c0_i32_0 = arith.constant 0 : i32
    %c0_i32_1 = arith.constant 0 : i32
    return %arg0, %c0_i32, %c0_i32_0 : i32, i32, i32
  }
  func.func @transform_6(%arg0: i32, %arg1: i32) -> (i32, i32, i32) {
    %c0_i32 = arith.constant 0 : i32
    %c0_i32_0 = arith.constant 0 : i32
    %c0_i32_1 = arith.constant 0 : i32
    return %arg0, %c0_i32, %c0_i32_0 : i32, i32, i32
  }
  func.func @transform_7(%arg0: i32, %arg1: i32) -> (i32, i32, i32) {
    %c0_i32 = arith.constant 0 : i32
    %c0_i32_0 = arith.constant 0 : i32
    return %arg0, %arg1, %c0_i32 : i32, i32, i32
  }
}

</mosaic_0001>

<bundles_post_ra>
// kernel: tpu_custom_call.1
= control target key start
LH: loop header
LB: loop body
LE: loop exit
PB: predicated region body
PF: predicated region fallthrough
CT: control target
= control target key end

     0   :  { %12 = vsyncpa [#allocation3], 0  ;;  %s2747_s0 = inlined_call_operand.vmem [shape: f32[2,16,31], index: 0, kind: input, shape index: {}]   ;;  %s2748_s1 = inlined_call_operand.vmem [shape: bf16[2,16,256], index: 1, kind: input, shape index: {}]   ;;  %s2749_s2 = inlined_call_operand.vmem [shape: bf16[2,16,256], index: 2, kind: input, shape index: {}]   ;;  %s2750_s3 = inlined_call_operand.vmem [shape: f32[2,5,128], index: 3, kind: input, shape index: {}]   ;;  %s2751_s4 = inlined_call_operand.vmem [shape: f32[2,26,128], index: 4, kind: input, shape index: {}]   ;;  %s2752_s5 = inlined_call_operand.hbm [shape: bf16[2,256,128], index: 5, kind: input, shape index: {}]   ;;  %s2753_s6 = inlined_call_operand.vmem [shape: f32[2,1,128], index: 6, kind: input, shape index: {}]   ;;  %s2754_s7 = inlined_call_operand.hbm [shape: f32[2,16,128], index: 7, kind: output, shape index: {}]  }
   0x1   :  { %14 = vsyncpa [#allocation3 + $0x1], 0 }
   0x2   :  { %15 = vsyncpa [#allocation4], 0 }
   0x3   :  { %17 = vsyncpa [#allocation4 + $0x1], 0  ;;  %s2137_s24 = smov 0   ;;  %s2139_s25 = smov 0  }
   0x4   :  { %s2141_s26 = smov 0   ;;  %s2143_s27 = smov 0  }
   0x5   :  { %s2145_s28 = smov 0   ;;  %s2147_s29 = smov 0  }
   0x6 LB: > { %s1756_s30 = sadd.s32 4294967295, %s2089_s29   ;;  %s1757_s8 = sadd.s32 4294967294, %s2089_s29   ;;  %s2089_s29 = sphi %s2147_s29, %s23_s29   ;;  %s2085_s28 = sphi %s2145_s28, %s2769_s28   ;;  %s2081_s27 = sphi %s2143_s27, %s2768_s27   ;;  %s2077_s26 = sphi %s2141_s26, %s2767_s26   ;;  %s2073_s25 = sphi %s2139_s25, %s2766_s25   ;;  %s2069_s24 = sphi %s2137_s24, %s2765_s24  }
   0x7   : > { %s35_s9 = sadd.s32 1, %s2085_s28  ;;  %s178_s10 = sadd.s32 1, %s2077_s26 }
   0x8   : > { %p37_p0 = scmp.ge.s32.totalorder %s35_s9, 2  ;;  %p185_p1 = scmp.ne.s32.totalorder %s2077_s26, %s2073_s25 }
   0x9   : > { %p186_p2 = scmp.eq.s32.totalorder %s2089_s29, 0  ;;  %p191_p3 = scmp.ne.s32.totalorder %s2073_s25, %s2069_s24 }
   0xa   : > { %s2771_s9 = smov (%p37_p0, %s35_s9), 0  ;;  %p192_p5 = scmp.eq.s32.totalorder %s1756_s30, 0 }
   0xb   : > { %p2178_p4 = por %p186_p2, %p185_p1  ;;  %s175_s12 = ssub.s32 %s2085_s28, %s2771_s9 }
   0xc   : > { %p243_p6 = scmp.eq.s32.totalorder %s1756_s30, 1  ;;  %p176_p7 = scmp.eq.s32.totalorder %s175_s12, 0 }
   0xd   : > { %p2184_p8 = por %p192_p5, %p191_p3  ;;  %p249_p10 = scmp.eq.s32.totalorder %s1757_s8, 1 }
   0xe   : > { %p2188_p9 = por %p243_p6, %p185_p1  ;;  %p1876_p13 = scmp.lt.s32.totalorder %s2089_s29, 2 }
   0xf   : > { %s2193_s15 = scalar_select %p176_p7, %s2077_s26, %s178_s10  }
  0x10   : > { %s2758_s14 = scalar_select %p2188_p9, 1, 0 }
  0x11   : > { %p2195_p11 = por %p249_p10, %p191_p3  ;;  %s325_s17 = sand.u32 1, %s2077_s26  }
  0x12   : > { %s1760_s18 = sshll.u32 %s325_s17, 7  ;;  %s1806_s19 = sshll.u32 %s2085_s28, 11 }
  0x13   : > { %s2759_s16 = scalar_select %p2195_p11, 1, 0 }
  0x14   : > { %s2206_s22 = scalar_lea.hbm %s2752_s5, %s1806_s19  ;;  %s329_s23 = scalar_lea.vmem [#allocation2], %s1760_s18 }
  0x15   : > { %s336_s30 = sshll.u32 %s329_s23, 4  ;;  %p2212_p0 = pnand %p1876_p13, %p2178_p4  ;;  %s2208_s30 = int_to_ptr.vmem [resolvable:$true] %s336_s30 }
  0x16   : > { %s2217_s10 = scalar_lea.sflag [#allocation3], %s325_s17  ;;  %s1977_s12 = scalar_lea.hbm %s2206_s22, 2048 }
  0x17   : > { %p1978_p2 = scmp.ne.s32.totalorder %s2206_s22, %s1977_s12  ;;  %p1979_p3 = pneg %p2212_p0 }
  0x18   : > { %s1982_s11 = scalar_lea.hbm %s2752_s5, 4096  ;;  %p1983_p4 = scmp.lt.u32.totalorder %s2206_s22, %s2752_s5 }
  0x19   : > { %p1980_p5 = pnand %p1979_p3, %p1978_p2  ;;  %p1984_p7 = scmp.lt.u32.totalorder %s1982_s11, %s1977_s12 }
  0x1a   : > { %p1986_p13 = scmp.lt.u32.totalorder %s1977_s12, %s2206_s22 }
  0x1b   : > { %p1981_p6 = pneg %p1980_p5  ;;  %p1985_p10 = por %p1984_p7, %p1983_p4 }
  0x1d   : > { %p1987_p12 = por %p1986_p13, %p1985_p10 }
  0x1f   : > { %p1988_p1 = pnand %p1987_p12, %p1981_p6 }
  0x21   : > { %1991 = shalt.err (!%p1988_p1)
}
  0x22   : > { %s1992_s17 = scalar_lea.vmem %s2208_s30, 2048  ;;  %s2091_s23 = smov [#allocation2]  }
  0x23   : > { %p1993_p2 = scmp.ne.s32.totalorder %s2208_s30, %s1992_s17  ;;  %s1997_s18 = sshll.u32 %s2091_s23, 4  ;;  %s1998_s18 = int_to_ptr.vmem [resolvable:$false] %s1997_s18 }
  0x24   : > { %s1999_s19 = scalar_lea.vmem %s1998_s18, 4096  ;;  %p2000_p9 = scmp.lt.s32.totalorder %s2208_s30, %s1998_s18 }
  0x25   : > { %p1995_p5 = pnand %p1993_p2, %p1979_p3  ;;  %p2001_p4 = scmp.lt.s32.totalorder %s1999_s19, %s1992_s17 }
  0x27   : > { %p1996_p11 = pneg %p1995_p5  ;;  %p2002_p7 = por %p2001_p4, %p2000_p9 }
  0x29   : > { %p2003_p10 = pnand %p2002_p7, %p1996_p11 }
  0x2b   : > { %2006 = shalt.err (!%p2003_p10)
}
  0x2c   : > { %s2092_s12 = smov 64   ;;  %s2093_s11 = smov 4  }
  0x2d   : > { %1871 = dma.hbm_to_vmem [thread:$0]  (!%p2212_p0), %s2206_s22, 2048, %s2208_s30, %s2217_s10, %s2092_s12, %s2092_s12, %s2093_s11  }
  0x2e   : > { %p350_p12 = scmp.lt.s32.totalorder %s2089_s29, 3  ;;  %p2761_p1 = scmp.ge.s32.totalorder %s2089_s29, 1 }
  0x30   : > { %p351_p3 = pnand %p2761_p1, %p350_p12 }
  0x31   : > { %s2249_s20 = sand.u32 (!%p351_p3), 1, %s2073_s25  }
  0x32   : > { %354 = sbr.rel (%p351_p3) target bundleno = 662 (0x296), region = 48  ;;  %s1764_s21 = sshll.u32 (!%p351_p3), %s2249_s20, 7 }
  0x33   : > { %s357_s17 = scalar_lea.sflag (!%p351_p3), [#allocation3], %s2249_s20  ;;  %s2253_s23 = scalar_lea.vmem (!%p351_p3), [#allocation2], %s1764_s21 }
  0x39   : > { %2060 = dma.done.wait (%p2184_p8), %s357_s17, 2048  }
  0x3a   : > { %2062 = vsyncadd (%p2184_p8), %s357_s17, 4294965248  ;;  %p433_p9 = scmp.lt.s32.totalorder %s2081_s27, 1  ;;  %v480_v0 = vlaneseq  ;;  %vm485_vm1 = vcmask 39936   ;;  %v2295_v12 = vld [vmem:[%s2253_s23 + $0x40] sm:$0xff]   ;;  %v2301_v14 = vld [vmem:[%s2253_s23 + $0x48] sm:$0xff]   ;;  %vm537_vm2 = vcmask 1044480  }
  0x3b   : > { %v2298_v13 = vld [vmem:[%s2253_s23] sm:$0xff]   ;;  %1815 = vmatprep.subr.bf16.mxu1 %v2295_v12  ;;  %v2310_v15 = vld [vmem:[%s2253_s23 + $0x8] sm:$0xff]   ;;  %v2314_v16 = vld [vmem:[%s2253_s23 + $0x50] sm:$0xff]   ;;  %vm1072_vm3 = vcmask 1041408   ;;  %vm1532_vm4 = vcmask 1041409   ;;  %vm1534_vm5 = vcmask 1042434  }
  0x3c   : > { %s2261_s22 = scalar_select %p433_p9, %s2081_s27, 1  ;;  %v2264_v1 = vand.u32 127, %v480_v0  ;;  %1816 = vmatpush3.bf16.msra.mxu1 %v2298_v13  ;;  %v2318_v23 = vld [vmem:[%s2253_s23 + $0x10] sm:$0xff]   ;;  %v2322_v24 = vld [vmem:[%s2253_s23 + $0x58] sm:$0xff]   ;;  %v2330_v30 = vld [vmem:[%s2253_s23 + $0x60] sm:$0xff]   ;;  %vm1536_vm6 = vcmask 1043459  }
  0x3d   : > { %1817 = vmatprep.subr.bf16.mxu1 %v2301_v14  ;;  %v2326_v29 = vld [vmem:[%s2253_s23 + $0x18] sm:$0xff]   ;;  %v2334_v31 = vld [vmem:[%s2253_s23 + $0x20] sm:$0xff]   ;;  %v2338_v32 = vld [vmem:[%s2253_s23 + $0x68] sm:$0xff]   ;;  %vm1538_vm7 = vcmask 1044484   ;;  %vm1540_vm8 = vcmask 1045509   ;;  %vm1542_vm9 = vcmask 1046534  }
  0x3e   : > { %s2267_s30 = sshll.u32 %s2261_s22, 4  ;;  %vm482_vm0 = vcmp.lt.s32.totalorder %v2264_v1, 2  ;;  %v2342_v33 = vld [vmem:[%s2253_s23 + $0x28] sm:$0xff]   ;;  %v2346_v35 = vld [vmem:[%s2253_s23 + $0x70] sm:$0xff]   ;;  %v2354_v43 = vld [vmem:[%s2253_s23 + $0x78] sm:$0xff]   ;;  %s1772_s11 = sshll.u32 %s2261_s22, 3 }
  0x3f   : > { %s440_s18 = scalar_lea.vmem %s2747_s0, %s2267_s30  ;;  %s451_s12 = scalar_lea.vmem %s2748_s1, %s2267_s30  ;;  %v2350_v41 = vld [vmem:[%s2253_s23 + $0x30] sm:$0xff]   ;;  %v2358_v45 = vld [vmem:[%s2253_s23 + $0x38] sm:$0xff]   ;;  %vm1544_vm10 = vcmask 1047559  }
  0x40   : > { %v2274_v2 = vld [vmem:[%s440_s18 + $0x8] sm:$0xff]  ;;  %v2276_v3 = vld [vmem:[%s440_s18] sm:$0xff]  ;;  %1818 = vmatpush3.bf16.msra.mxu1 %v2310_v15  ;;  %s467_s23 = scalar_lea.vmem %s2750_s3, %s1772_s11  ;;  %s2416_s18 = scalar_lea.vmem %s2749_s2, %s2267_s30 }
  0x41   : > { %v484_v4 = vsel %vm482_vm0, %v2274_v2, -inf  ;;  %v483_v5 = vsel %vm482_vm0, %v2276_v3, -inf  ;;  %v493_v6 = vsel %vm482_vm0, -inf, %v2274_v2  ;;  %v492_v7 = vsel %vm482_vm0, -inf, %v2276_v3  ;;  %v1264_v17 = vld [vmem:[%s451_s12 + $0x8] sm:$0xff]  ;;  %v1263_v18 = vld [vmem:[%s451_s12] sm:$0xff]  ;;  %1819 = vmatprep.subr.bf16.mxu1 %v2314_v16  ;;  %s475_s17 = scalar_lea.vmem %s2753_s6, %s2261_s22 }
  0x42   : > { %v489_v8 = vsel %vm485_vm1, %v484_v4, -inf  ;;  %v486_v9 = vsel %vm485_vm1, %v483_v5, -inf  ;;  %v497_v10 = vsel %vm485_vm1, %v493_v6, -inf  ;;  %v494_v11 = vsel %vm485_vm1, %v492_v7, -inf  ;;  %s1810_s30 = sshll.u32 %s2261_s22, 5  ;;  %s1765_s22 = sshll.u32 %s2249_s20, 4 }
  0x43   : > { %490 = vmax.xlane.f32.xlu1 %v489_v8  ;;  %487 = vmax.xlane.f32.xlu0 %v486_v9  ;;  %v1267_v19 = vunpack.c.l.bf16 %v1264_v17  ;;  %v1268_v20 = vunpack.c.h.bf16 %v1264_v17  ;;  %v1265_v21 = vunpack.c.l.bf16 %v1263_v18  ;;  %v1266_v22 = vunpack.c.h.bf16 %v1263_v18  ;;  %s472_s12 = scalar_lea.vmem %s2751_s4, %s1810_s30  ;;  %s1811_s10 = sshll.u32 %s2081_s27, 8 }
  0x44   : > { %1820 = vmatpush3.bf16.msra.mxu1 %v2318_v23  ;;  %s2698_s13 = scalar_lea.hbm %s2754_s7, %s1811_s10  ;;  %s1564_s19 = scalar_lea.sflag [#allocation4], %s2249_s20 }
  0x45   : > { %v1780_v25 = vmul.f32 -1.442695, %v1267_v19  ;;  %v1781_v26 = vmul.f32 -1.442695, %v1268_v20  ;;  %v1778_v27 = vmul.f32 -1.442695, %v1265_v21  ;;  %1821 = vmatprep.subr.bf16.mxu1 %v2322_v24 }
  0x46   : > { %v1779_v28 = vmul.f32 -1.442695, %v1266_v22  ;;  %v2393_v19 = vshrl.u32 %v480_v0, 7  ;;  %p2762_p11 = scmp.ne.s32.totalorder %s2758_s14, 0  ;;  %s2094_s27 = smov [#allocation5]  }
  0x47   : > { %498 = vmax.xlane.f32.xlu1 %v497_v10  ;;  %495 = vmax.xlane.f32.xlu0 %v494_v11  ;;  %1949 = vpow2.f32 %v1780_v25  ;;  %s2011_s11 = sshll.u32 %s2094_s27, 4  ;;  %s2012_s11 = int_to_ptr.vmem [resolvable:$false] %s2011_s11 }
  0x48   : > { %1951 = vpow2.f32 %v1781_v26  ;;  %1822 = vmatpush3.bf16.msra.mxu1 %v2326_v29  ;;  %v624_v20 = vsub.s32 0, %v2393_v19  ;;  %v644_v22 = vsub.s32 1, %v2393_v19  ;;  %v530_v26 = vld [vmem:[%s467_s23] sm:$0x1f]  ;;  %v664_v0 = vsub.s32 2, %v2393_v19  ;;  %s431_s23 = scalar_lea.vmem [#allocation5], %s1765_s22 }
  0x49   : > { %1953 = vpow2.f32 %v1779_v28  ;;  %1823 = vmatprep.subr.bf16.mxu1 %v2330_v30  ;;  %1859 = vmatprep.subr.msk.mxu0 %vm537_vm2, %v530_v26  ;;  %v684_v28 = vsub.s32 3, %v2393_v19  ;;  %s1579_s8 = sshll.u32 %s431_s23, 4  ;;  %s2013_s21 = scalar_lea.vmem %s2012_s11, 512  ;;  %s2693_s8 = int_to_ptr.vmem [resolvable:$true] %s1579_s8 }
  0x4a   : > { %1955 = vpow2.f32 %v1778_v27  ;;  %v625_v21 = vrot.slane %v2276_v3, %v624_v20  ;;  %v645_v25 = vrot.slane %v2276_v3, %v644_v22  ;;  %1860 = vmatpush3.msk.msra.mxu0 %vm537_vm2, %v530_v26  ;;  %v665_v27 = vrot.slane %v2276_v3, %v664_v0  ;;  %p2014_p13 = scmp.lt.s32.totalorder %s2693_s8, %s2012_s11 }
  0x4b   : > { %1837 = vmatprep.subr.bf16.mxu0 %v2295_v12 }
  0x4c   : > { %1824 = vmatpush3.bf16.msra.mxu1 %v2334_v31 }
  0x4d   : > { %1825 = vmatprep.subr.bf16.mxu1 %v2338_v32 }
  0x50   : > { %1826 = vmatpush3.bf16.msra.mxu1 %v2342_v33 }
  0x51   : > { %v1950_v34 = vpop.eup %1949  ;;  %1827 = vmatprep.subr.bf16.mxu1 %v2346_v35 }
  0x52   : > { %v1952_v36 = vpop.eup %1951  ;;  %v1283_v37 = vadd.f32 1.0, %v1950_v34  ;;  %v685_v34 = vrot.slane %v2276_v3, %v684_v28 }
  0x53   : > { %v1954_v38 = vpop.eup %1953  ;;  %v1284_v39 = vadd.f32 1.0, %v1952_v36  ;;  %v704_v36 = vsub.s32 4, %v2393_v19 }
  0x54   : > { %v1956_v40 = vpop.eup %1955  ;;  %1957 = vrcp.f32 %v1283_v37  ;;  %v1282_v42 = vadd.f32 1.0, %v1954_v38  ;;  %1828 = vmatpush3.bf16.msra.mxu1 %v2350_v41  ;;  %v724_v37 = vsub.s32 5, %v2393_v19 }
  0x55   : > { %1959 = vrcp.f32 %v1284_v39  ;;  %v1281_v44 = vadd.f32 1.0, %v1956_v40  ;;  %1829 = vmatprep.subr.bf16.mxu1 %v2354_v43  ;;  %v705_v12 = vrot.slane %v2276_v3, %v704_v36  ;;  %v744_v39 = vsub.s32 6, %v2393_v19 }
  0x56   : > { %1961 = vrcp.f32 %v1282_v42  ;;  %v725_v38 = vrot.slane %v2276_v3, %v724_v37  ;;  %v785_v42 = vrot.slane %v2274_v2, %v624_v20  ;;  %v2453_v1 = vrot.slane %v2274_v2, %v724_v37 }
  0x57   : > { %1963 = vrcp.f32 %v1281_v44  ;;  %v2422_v40 = vrot.slane %v2276_v3, %v744_v39  ;;  %v805_v44 = vrot.slane %v2274_v2, %v644_v22 }
  0x58   : > { %1830 = vmatpush3.bf16.msra.mxu1 %v2358_v45 }
  0x5e   : > { %v1958_v46 = vpop.eup %1957 }
  0x5f   : > { %v1960_v47 = vpop.eup %1959 }
  0x60   : > { %v1962_v50 = vpop.eup %1961  ;;  %v2362_v51 = vadd.f32 %v1960_v47, %v1958_v46 }
  0x61   : > { %v1964_v52 = vpop.eup %1963  ;;  %v1300_v53 = vpack.c.bf16 %v1960_v47, %v1962_v50  ;;  %v845_v47 = vrot.slane %v2274_v2, %v684_v28 }
  0x62   : > { %v1299_v54 = vpack.c.bf16 %v1958_v46, %v1964_v52  ;;  %v2364_v55 = vadd.f32 %v1964_v52, %v1962_v50  ;;  %v825_v46 = vrot.slane %v2274_v2, %v664_v0 }
  0x63   : > { %1429 = vmatprep.mubr.bf16.mxu1 %v1300_v53 }
  0x64   : > { %1430 = vmatmul.mubr.bf16.vlgmr.msra.gmra.mrb[0].mxu1 %v1299_v54 }
  0xd0   : > { %v491_v48 = vpop.xlane.xlu1 %490  ;;  %v488_v49 = vpop.xlane.xlu0 %487 }
  0xd4   : > { %v499_v56 = vpop.xlane.xlu1 %498  ;;  %v496_v57 = vpop.xlane.xlu0 %495 }
  0xd5   : > { %v501_v58 = vsel %vm482_vm0, %v491_v48, %v499_v56  ;;  %v500_v59 = vsel %vm482_vm0, %v488_v49, %v496_v57  ;;  %v2445_v56 = vld [vmem:[%s472_s12] sm:$0xff] }
  0xd6   : > { %v503_v60 = vsub.f32 %v2274_v2, %v501_v58  ;;  %v502_v61 = vsub.f32 %v2276_v3, %v500_v59 }
  0xd8   : > { %v506_v62 = vmul.f32 1.442695, %v503_v60  ;;  %v504_v63 = vmul.f32 1.442695, %v502_v61  ;;  %v2450_v61 = vld [vmem:[%s472_s12 + $0x10] sm:$0xff] }
  0xda   : > { %1965 = vpow2.f32 %v506_v62 }
  0xdb   : > { %1967 = vpow2.f32 %v504_v63 }
  0xe4   : > { %v2372_v4 = vpop.eup %1965 }
  0xe5   : > { %v2374_v5 = vpop.eup %1967  ;;  %v517_v10 = vsel %vm482_vm0, 0.0, %v2372_v4  ;;  %v509_v11 = vsel %vm482_vm0, %v2372_v4, 0.0 }
  0xe6   : > { %v516_v6 = vsel %vm482_vm0, 0.0, %v2374_v5  ;;  %v508_v7 = vsel %vm482_vm0, %v2374_v5, 0.0  ;;  %v521_v17 = vsel %vm485_vm1, %v517_v10, 0.0  ;;  %v513_v18 = vsel %vm485_vm1, %v509_v11, 0.0 }
  0xe7   : > { %v518_v8 = vsel %vm485_vm1, %v516_v6, 0.0  ;;  %v510_v9 = vsel %vm485_vm1, %v508_v7, 0.0 }
  0xe8   : > { %519 = vadd.xlane.f32.xlu1 %v518_v8  ;;  %511 = vadd.xlane.f32.xlu0 %v510_v9 }
  0xec   : > { %522 = vadd.xlane.f32.xlu1 %v521_v17  ;;  %514 = vadd.xlane.f32.xlu0 %v513_v18  ;;  %v2457_v17 = vld [vmem:[%s472_s12 + $0x18] sm:$0x3] }
  0xfd   : > { %632 = vbcast.lane.b32.xlu1 %v625_v21, 269 }
 0x101   : > { %636 = vbcast.lane.b32.xlu1 %v625_v21, 277 }
 0x102   : > { %628 = vbcast.lane.b32.xlu0 %v625_v21, 261 }
 0x105   : > { %640 = vbcast.lane.b32.xlu1 %v625_v21, 285 }
 0x106   : > { %648 = vbcast.lane.b32.xlu0 %v645_v25, 261 }
 0x109   : > { %652 = vbcast.lane.b32.xlu1 %v645_v25, 269 }
 0x10a   : > { %656 = vbcast.lane.b32.xlu0 %v645_v25, 277 }
 0x10d   : > { %660 = vbcast.lane.b32.xlu1 %v645_v25, 285  ;;  %v1948_v25 = vld [vmem:[%s2416_s18 + $0x4] ss:$8 sps:$4 sm:$0xff]  }
 0x10e   : > { %668 = vbcast.lane.b32.xlu0 %v665_v27, 261 }
 0x111   : > { %672 = vbcast.lane.b32.xlu1 %v665_v27, 269 }
 0x112   : > { %676 = vbcast.lane.b32.xlu0 %v665_v27, 277 }
 0x115   : > { %680 = vbcast.lane.b32.xlu1 %v665_v27, 285 }
 0x116   : > { %688 = vbcast.lane.b32.xlu0 %v685_v34, 261 }
 0x119   : > { %692 = vbcast.lane.b32.xlu1 %v685_v34, 269 }
 0x11a   : > { %696 = vbcast.lane.b32.xlu0 %v685_v34, 277 }
 0x11d   : > { %700 = vbcast.lane.b32.xlu1 %v685_v34, 285 }
 0x11e   : > { %708 = vbcast.lane.b32.xlu0 %v705_v12, 261 }
 0x121   : > { %712 = vbcast.lane.b32.xlu1 %v705_v12, 269 }
 0x122   : > { %716 = vbcast.lane.b32.xlu0 %v705_v12, 277 }
 0x125   : > { %720 = vbcast.lane.b32.xlu1 %v705_v12, 285 }
 0x126   : > { %728 = vbcast.lane.b32.xlu0 %v725_v38, 261 }
 0x129   : > { %732 = vbcast.lane.b32.xlu1 %v725_v38, 269 }
 0x12a   : > { %736 = vbcast.lane.b32.xlu0 %v725_v38, 277 }
 0x12d   : > { %740 = vbcast.lane.b32.xlu1 %v725_v38, 285 }
 0x12e   : > { %748 = vbcast.lane.b32.xlu0 %v2422_v40, 261 }
 0x14d   : > { %1297 = vadd.xlane.f32.xlu0 %v2362_v51  ;;  %v2435_v51 = vrot.slane %v2274_v2, %v704_v36 }
 0x151   : > { %1294 = vadd.xlane.f32.xlu1 %v2364_v55  ;;  %v2442_v55 = vld [vmem:[%s472_s12 + $0x8] sm:$0xff]  ;;  %s2007_s12 = scalar_lea.vmem %s2693_s8, 256 }
 0x152   : > { %p2008_p8 = scmp.ne.s32.totalorder %s2693_s8, %s2007_s12  ;;  %p2015_p2 = scmp.lt.s32.totalorder %s2013_s21, %s2007_s12 }
 0x154   : > { %p2009_p0 = pnand %p2008_p8, %p2762_p11  ;;  %p2016_p5 = por %p2015_p2, %p2014_p13 }
 0x156   : > { %p2010_p6 = pneg %p2009_p0 }
 0x158   : > { %p2017_p4 = pnand %p2016_p5, %p2010_p6 }
 0x162   : > { %792 = vbcast.lane.b32.xlu1 %v785_v42, 269 }
 0x163   : > { %788 = vbcast.lane.b32.xlu0 %v785_v42, 261 }
 0x166   : > { %808 = vbcast.lane.b32.xlu1 %v805_v44, 261 }
 0x167   : > { %812 = vbcast.lane.b32.xlu0 %v805_v44, 269 }
 0x16a   : > { %828 = vbcast.lane.b32.xlu1 %v825_v46, 261 }
 0x16b   : > { %832 = vbcast.lane.b32.xlu0 %v825_v46, 269 }
 0x16e   : > { %796 = vbcast.lane.b32.xlu1 %v785_v42, 277 }
 0x16f   : > { %816 = vbcast.lane.b32.xlu0 %v805_v44, 277 }
 0x172   : > { %848 = vbcast.lane.b32.xlu1 %v845_v47, 261 }
 0x173   : > { %852 = vbcast.lane.b32.xlu0 %v845_v47, 269 }
 0x175   : > { %v520_v48 = vpop.xlane.xlu1 %519  ;;  %v512_v49 = vpop.xlane.xlu0 %511 }
 0x176   : > { %v524_v50 = vsel %vm482_vm0, %v512_v49, %v520_v48  ;;  %800 = vbcast.lane.b32.xlu1 %v785_v42, 285 }
 0x177   : > { %1969 = vrcp.f32 %v524_v50  ;;  %820 = vbcast.lane.b32.xlu0 %v805_v44, 285  ;;  %v2477_v44 = vrot.slane %v2274_v2, %v744_v39 }
 0x179   : > { %v523_v52 = vpop.xlane.xlu1 %522  ;;  %v515_v53 = vpop.xlane.xlu0 %514 }
 0x17a   : > { %v525_v54 = vsel %vm482_vm0, %v515_v53, %v523_v52  ;;  %836 = vbcast.lane.b32.xlu1 %v825_v46, 277 }
 0x17b   : > { %1971 = vrcp.f32 %v525_v54  ;;  %868 = vbcast.lane.b32.xlu0 %v2435_v51, 261 }
 0x17d   : > { %v633_v57 = vpop.permute.xlu1 %632  ;;  %v629_v58 = vpop.permute.xlu0 %628 }
 0x17e   : > { %v943_v59 = vsub.f32 %v633_v57, %v2442_v55  ;;  %v942_v60 = vsub.f32 %v629_v58, %v2445_v56  ;;  %872 = vbcast.lane.b32.xlu1 %v2435_v51, 269 }
 0x17f   : > { %840 = vbcast.lane.b32.xlu0 %v825_v46, 285 }
 0x180   : > { %v1007_v62 = vand.u32 2147483647, %v943_v59  ;;  %v1006_v63 = vand.u32 2147483647, %v942_v60 }
 0x181   : > { %v1970_v6 = vpop.eup %1969  ;;  %v637_v7 = vpop.permute.xlu1 %636 }
 0x182   : > { %v649_v8 = vpop.permute.xlu0 %648  ;;  %v944_v9 = vsub.f32 %v637_v7, %v2450_v61  ;;  %v527_v10 = vmul.f32 %v1970_v6, %v2374_v5  ;;  %v1070_v11 = vadd.f32 %v1007_v62, %v1006_v63  ;;  %856 = vbcast.lane.b32.xlu1 %v845_v47, 277 }
 0x183   : > { %888 = vbcast.lane.b32.xlu0 %v2453_v1, 261  ;;  %v946_v5 = vsub.f32 %v649_v8, %v2445_v56 }
 0x184   : > { %v1008_v18 = vand.u32 2147483647, %v944_v9  ;;  %1861 = vmatprep.mubr.msk.f32.mxu0 %vm485_vm1, %v527_v10 }
 0x185   : > { %v1972_v20 = vpop.eup %1971  ;;  %v641_v21 = vpop.permute.xlu1 %640 }
 0x186   : > { %v657_v22 = vpop.permute.xlu0 %656  ;;  %v1071_v26 = vadd.f32 %v1070_v11, %v1008_v18  ;;  %v945_v0 = vsub.f32 %v641_v21, %v2457_v17  ;;  %v529_v27 = vmul.f32 %v1972_v20, %v2372_v4  ;;  %892 = vbcast.lane.b32.xlu1 %v2453_v1, 269  ;;  %v1010_v4 = vand.u32 2147483647, %v946_v5 }
 0x187   : > { %752 = vbcast.lane.b32.xlu0 %v2422_v40, 269  ;;  %v948_v34 = vsub.f32 %v657_v22, %v2450_v61 }
 0x188   : > { %v1009_v28 = vand.u32 2147483647, %v945_v0  ;;  %1862 = vmatmul.mubr.msk.f32.vlgmr.msra.gmra.mrb[0].mxu0 %vm485_vm1, %v529_v27 }
 0x189   : > { %1838 = vmatpush3.bf16.msra.mxu0 %v2298_v13  ;;  %v653_v36 = vpop.permute.xlu1 %652  ;;  %1482 = vmatprep.mubr.bf16.mxu0 %v1948_v25  ;;  %v764_v13 = vsub.s32 7, %v2393_v19  ;;  %v1012_v48 = vand.u32 2147483647, %v948_v34 }
 0x18a   : > { %v669_v12 = vpop.permute.xlu0 %668  ;;  %v1073_v37 = vsel %vm1072_vm3, %v1009_v28, 0.0  ;;  %v947_v38 = vsub.f32 %v653_v36, %v2442_v55  ;;  %1839 = vmatprep.subr.bf16.mxu0 %v2301_v14  ;;  %860 = vbcast.lane.b32.xlu1 %v845_v47, 285 }
 0x18b   : > { %v1074_v42 = vadd.f32 %v1073_v37, %v1071_v26  ;;  %876 = vbcast.lane.b32.xlu0 %v2435_v51, 277  ;;  %v950_v47 = vsub.f32 %v669_v12, %v2445_v56  ;;  %v2487_v19 = vrot.slane %v2276_v3, %v764_v13  ;;  %v2503_v21 = vrot.slane %v2274_v2, %v764_v13 }
 0x18c   : > { %v1011_v46 = vand.u32 2147483647, %v947_v38 }
 0x18d   : > { %v1075_v49 = vrot.slane %v1074_v42, 4  ;;  %1840 = vmatpush3.bf16.msra.mxu0 %v2310_v15  ;;  %v661_v50 = vpop.permute.xlu1 %660  ;;  %v1014_v62 = vand.u32 2147483647, %v950_v47 }
 0x18e   : > { %v677_v52 = vpop.permute.xlu0 %676  ;;  %v1081_v53 = vadd.f32 %v1011_v46, %v1010_v4  ;;  %v949_v14 = vsub.f32 %v661_v50, %v2457_v17  ;;  %1841 = vmatprep.subr.bf16.mxu0 %v2314_v16  ;;  %908 = vbcast.lane.b32.xlu1 %v2477_v44, 261 }
 0x18f   : > { %v1076_v39 = vadd.f32 %v1075_v49, %v1074_v42  ;;  %912 = vbcast.lane.b32.xlu0 %v2477_v44, 269  ;;  %v952_v15 = vsub.f32 %v677_v52, %v2450_v61 }
 0x190   : > { %v1082_v54 = vadd.f32 %v1081_v53, %v1012_v48  ;;  %v1013_v57 = vand.u32 2147483647, %v949_v14 }
 0x191   : > { %v1077_v58 = vrot.slane %v1076_v39, 2  ;;  %1842 = vmatpush3.bf16.msra.mxu0 %v2318_v23  ;;  %v673_v59 = vpop.permute.xlu1 %672  ;;  %v1016_v7 = vand.u32 2147483647, %v952_v15 }
 0x192   : > { %v689_v60 = vpop.permute.xlu0 %688  ;;  %v1083_v16 = vsel %vm1072_vm3, %v1013_v57, 0.0  ;;  %v951_v63 = vsub.f32 %v673_v59, %v2442_v55  ;;  %1843 = vmatprep.subr.bf16.mxu0 %v2322_v24  ;;  %768 = vbcast.lane.b32.xlu1 %v2487_v19, 261 }
 0x193   : > { %v1084_v3 = vadd.f32 %v1083_v16, %v1082_v54  ;;  %772 = vbcast.lane.b32.xlu0 %v2487_v19, 269  ;;  %v1078_v8 = vadd.f32 %v1077_v58, %v1076_v39  ;;  %v954_v24 = vsub.f32 %v689_v60, %v2445_v56  ;;  %v1946_v60 = vld [vmem:[%s2416_s18] ss:$8 sps:$4 sm:$0xff]  }
 0x194   : > { %v1015_v6 = vand.u32 2147483647, %v951_v63 }
 0x195   : > { %v1085_v9 = vrot.slane %v1084_v3, 4  ;;  %1844 = vmatpush3.bf16.msra.mxu0 %v2326_v29  ;;  %v681_v23 = vpop.permute.xlu1 %680  ;;  %v1079_v26 = vrot.slane %v1078_v8, 1  ;;  %v1018_v28 = vand.u32 2147483647, %v954_v24 }
 0x196   : > { %v697_v10 = vpop.permute.xlu0 %696  ;;  %v1091_v11 = vadd.f32 %v1015_v6, %v1014_v62  ;;  %v953_v18 = vsub.f32 %v681_v23, %v2457_v17  ;;  %1845 = vmatprep.subr.bf16.mxu0 %v2330_v30  ;;  %880 = vbcast.lane.b32.xlu1 %v2435_v51, 285 }
 0x197   : > { %v1086_v20 = vadd.f32 %v1085_v9, %v1084_v3  ;;  %896 = vbcast.lane.b32.xlu0 %v2453_v1, 277  ;;  %v956_v29 = vsub.f32 %v697_v10, %v2450_v61  ;;  %v1080_v37 = vadd.f32 %v1079_v26, %v1078_v8 }
 0x198   : > { %v1092_v22 = vadd.f32 %v1091_v11, %v1016_v7  ;;  %v1017_v25 = vand.u32 2147483647, %v953_v18 }
 0x199   : > { %v1087_v0 = vrot.slane %v1086_v20, 2  ;;  %1846 = vmatpush3.bf16.msra.mxu0 %v2334_v31  ;;  %v693_v27 = vpop.permute.xlu1 %692  ;;  %v1020_v12 = vand.u32 2147483647, %v956_v29 }
 0x19a   : > { %v709_v30 = vpop.permute.xlu0 %708  ;;  %v1093_v5 = vsel %vm1072_vm3, %v1017_v25, 0.0  ;;  %v955_v51 = vsub.f32 %v693_v27, %v2442_v55  ;;  %1847 = vmatprep.subr.bf16.mxu0 %v2338_v32  ;;  %928 = vbcast.lane.b32.xlu1 %v2503_v21, 261 }
 0x19b   : > { %v1088_v2 = vadd.f32 %v1087_v0, %v1086_v20  ;;  %v1094_v34 = vadd.f32 %v1093_v5, %v1092_v22  ;;  %932 = vbcast.lane.b32.xlu0 %v2503_v21, 269  ;;  %v958_v32 = vsub.f32 %v709_v30, %v2445_v56 }
 0x19c   : > { %v1019_v36 = vand.u32 2147483647, %v955_v51 }
 0x19d   : > { %v1089_v4 = vrot.slane %v1088_v2, 1  ;;  %v1095_v31 = vrot.slane %v1094_v34, 4  ;;  %1848 = vmatpush3.bf16.msra.mxu0 %v2342_v33  ;;  %v701_v38 = vpop.permute.xlu1 %700  ;;  %v1022_v54 = vand.u32 2147483647, %v958_v32 }
 0x19e   : > { %v717_v42 = vpop.permute.xlu0 %716  ;;  %v1101_v13 = vadd.f32 %v1019_v36, %v1018_v28  ;;  %v957_v46 = vsub.f32 %v701_v38, %v2457_v17  ;;  %1849 = vmatprep.subr.bf16.mxu0 %v2346_v35  ;;  %756 = vbcast.lane.b32.xlu1 %v2422_v40, 277 }
 0x19f   : > { %v1090_v48 = vadd.f32 %v1089_v4, %v1088_v2  ;;  %v1096_v49 = vadd.f32 %v1095_v31, %v1094_v34  ;;  %900 = vbcast.lane.b32.xlu0 %v2453_v1, 285  ;;  %v960_v33 = vsub.f32 %v717_v42, %v2450_v61 }
 0x1a0   : > { %v1102_v50 = vadd.f32 %v1101_v13, %v1020_v12  ;;  %v1021_v52 = vand.u32 2147483647, %v957_v46 }
 0x1a1   : > { %v1533_v53 = vsel %vm1532_vm4, %v1090_v48, %v1080_v37  ;;  %v1097_v14 = vrot.slane %v1096_v49, 2  ;;  %1850 = vmatpush3.bf16.msra.mxu0 %v2350_v41  ;;  %v713_v47 = vpop.permute.xlu1 %712  ;;  %v1024_v59 = vand.u32 2147483647, %v960_v33 }
 0x1a2   : > { %v729_v35 = vpop.permute.xlu0 %728  ;;  %v1103_v39 = vsel %vm1072_vm3, %v1021_v52, 0.0  ;;  %v959_v57 = vsub.f32 %v713_v47, %v2442_v55  ;;  %1851 = vmatprep.subr.bf16.mxu0 %v2354_v43  ;;  %916 = vbcast.lane.b32.xlu1 %v2477_v44, 277 }
 0x1a3   : > { %v1098_v1 = vadd.f32 %v1097_v14, %v1096_v49  ;;  %v1104_v15 = vadd.f32 %v1103_v39, %v1102_v50  ;;  %760 = vbcast.lane.b32.xlu0 %v2422_v40, 285  ;;  %v962_v43 = vsub.f32 %v729_v35, %v2445_v56 }
 0x1a4   : > { %v1023_v58 = vand.u32 2147483647, %v959_v57 }
 0x1a5   : > { %v1099_v16 = vrot.slane %v1098_v1, 1  ;;  %v1105_v41 = vrot.slane %v1104_v15, 4  ;;  %1852 = vmatpush3.bf16.msra.mxu0 %v2358_v45  ;;  %v721_v62 = vpop.permute.xlu1 %720  ;;  %v1831_v45 = vpop.f32.mrb[0].mxu1  ;;  %v1026_v20 = vand.u32 2147483647, %v962_v43 }
 0x1a6   : > { %v737_v63 = vpop.permute.xlu0 %736  ;;  %v1111_v3 = vadd.f32 %v1023_v58, %v1022_v54  ;;  %v961_v6 = vsub.f32 %v721_v62, %v2457_v17  ;;  %776 = vbcast.lane.b32.xlu1 %v2487_v19, 277  ;;  %v1832_v25 = vpop.f32.mrb[1].mxu1  ;;  %v1800_v54 = vld [vmem:[%s475_s17] ss:$0 sm:$0xff] }
 0x1a7   : > { %v1100_v7 = vadd.f32 %v1099_v16, %v1098_v1  ;;  %v1106_v8 = vadd.f32 %v1105_v41, %v1104_v15  ;;  %920 = vbcast.lane.b32.xlu0 %v2477_v44, 285  ;;  %v964_v23 = vsub.f32 %v737_v63, %v2450_v61  ;;  %v1833_v26 = vadd.f32 %v1832_v25, %v1831_v45  ;;  %v1834_v0 = vpop.f32.mrb[2].mxu1 }
 0x1a8   : > { %v1112_v40 = vadd.f32 %v1111_v3, %v1024_v59  ;;  %v1025_v9 = vand.u32 2147483647, %v961_v6  ;;  %1483 = vmatmul.mubr.bf16.vlgmr.msra.gmra.mrb[4].mxu0 %v1946_v60  ;;  %v1835_v5 = vpop.f32.mrb[3].mxu1 }
 0x1a9   : > { %v1535_v10 = vsel %vm1534_vm5, %v1100_v7, %v1533_v53  ;;  %v1107_v11 = vrot.slane %v1106_v8, 2  ;;  %v733_v18 = vpop.permute.xlu1 %732  ;;  %v1028_v30 = vand.u32 2147483647, %v964_v23  ;;  %v1836_v34 = vadd.f32 %v1835_v5, %v1834_v0 }
 0x1aa   : > { %v1113_v24 = vsel %vm1072_vm3, %v1025_v9, 0.0  ;;  %v963_v22 = vsub.f32 %v733_v18, %v2442_v55  ;;  %936 = vbcast.lane.b32.xlu1 %v2503_v21, 277  ;;  %v2546_v39 = vpop.permute.xlu0 %748  ;;  %v1492_v9 = vmul.f32 2.0, %v1833_v26 }
 0x1ab   : > { %v1108_v29 = vadd.f32 %v1107_v11, %v1106_v8  ;;  %v1114_v44 = vadd.f32 %v1113_v24, %v1112_v40  ;;  %780 = vbcast.lane.b32.xlu0 %v2487_v19, 285  ;;  %v1493_v3 = vmul.f32 2.0, %v1836_v34 }
 0x1ac   : > { %v1027_v27 = vand.u32 2147483647, %v963_v22  ;;  %v1494_v24 = vadd.f32 1.0, %v1492_v9 }
 0x1ad   : > { %v1109_v28 = vrot.slane %v1108_v29, 1  ;;  %v1115_v51 = vrot.slane %v1114_v44, 4  ;;  %v741_v2 = vpop.permute.xlu1 %740  ;;  %v1495_v23 = vadd.f32 1.0, %v1493_v3 }
 0x1ae   : > { %v1121_v36 = vadd.f32 %v1027_v27, %v1026_v20  ;;  %v965_v12 = vsub.f32 %v741_v2, %v2457_v17  ;;  %940 = vbcast.lane.b32.xlu1 %v2503_v21, 285 }
 0x1af   : > { %v1110_v37 = vadd.f32 %v1109_v28, %v1108_v29  ;;  %v1116_v4 = vadd.f32 %v1115_v51, %v1114_v44 }
 0x1b0   : > { %v1122_v31 = vadd.f32 %v1121_v36, %v1028_v30  ;;  %v1029_v38 = vand.u32 2147483647, %v965_v12 }
 0x1b1   : > { %v1117_v19 = vrot.slane %v1116_v4, 2  ;;  %v1537_v42 = vsel %vm1536_vm6, %v1110_v37, %v1535_v10 }
 0x1b2   : > { %v1123_v13 = vsel %vm1072_vm3, %v1029_v38, 0.0 }
 0x1b3   : > { %v1118_v46 = vadd.f32 %v1117_v19, %v1116_v4  ;;  %v1124_v32 = vadd.f32 %v1123_v13, %v1122_v31 }
 0x1b5   : > { %v1119_v48 = vrot.slane %v1118_v46, 1  ;;  %v1125_v49 = vrot.slane %v1124_v32, 4 }
 0x1b7   : > { %v1120_v50 = vadd.f32 %v1119_v48, %v1118_v46  ;;  %v1126_v52 = vadd.f32 %v1125_v49, %v1124_v32 }
 0x1b9   : > { %v1127_v33 = vrot.slane %v1126_v52, 2  ;;  %v1539_v21 = vsel %vm1538_vm7, %v1120_v50, %v1537_v42 }
 0x1bb   : > { %v1128_v53 = vadd.f32 %v1127_v33, %v1126_v52 }
 0x1bd   : > { %v1129_v14 = vrot.slane %v1128_v53, 1 }
 0x1bf   : > { %v1130_v47 = vadd.f32 %v1129_v14, %v1128_v53 }
 0x1c1   : > { %v2544_v35 = vsel %vm1540_vm8, %v1130_v47, %v1539_v21  ;;  %v966_v21 = vsub.f32 %v2546_v39, %v2445_v56 }
 0x1da   : > { %v1298_v57 = vpop.xlane.xlu0 %1297 }
 0x1db   : > { %v1503_v1 = vadd.f32 %v1800_v54, %v1298_v57 }
 0x1dd   : > { %v1505_v15 = vadd.f32 1.0, %v1503_v1 }
 0x1de   : > { %v1295_v58 = vpop.xlane.xlu1 %1294  ;;  %v789_v59 = vpop.permute.xlu0 %788 }
 0x1df   : > { %1973 = vrcp.f32 %v1505_v15  ;;  %v1502_v60 = vadd.f32 %v1800_v54, %v1295_v58  ;;  %v974_v16 = vsub.f32 %v789_v59, %v2445_v56 }
 0x1e1   : > { %v1504_v41 = vadd.f32 1.0, %v1502_v60  ;;  %v1038_v6 = vand.u32 2147483647, %v974_v16  ;;  %v1030_v16 = vand.u32 2147483647, %v966_v21 }
 0x1e2   : > { %v793_v62 = vpop.permute.xlu1 %792  ;;  %v813_v63 = vpop.permute.xlu0 %812 }
 0x1e3   : > { %1975 = vrcp.f32 %v1504_v41  ;;  %v975_v43 = vsub.f32 %v793_v62, %v2442_v55  ;;  %v979_v48 = vsub.f32 %v813_v63, %v2442_v55 }
 0x1e5   : > { %v1039_v7 = vand.u32 2147483647, %v975_v43  ;;  %v1043_v14 = vand.u32 2147483647, %v979_v48 }
 0x1e6   : > { %v809_v8 = vpop.permute.xlu1 %808  ;;  %v833_v40 = vpop.permute.xlu0 %832 }
 0x1e7   : > { %v2554_v45 = vadd.f32 %v1039_v7, %v1038_v6  ;;  %v978_v50 = vsub.f32 %v809_v8, %v2445_v56  ;;  %v983_v53 = vsub.f32 %v833_v40, %v2442_v55 }
 0x1e9   : > { %v1974_v10 = vpop.eup %1973  ;;  %v1042_v57 = vand.u32 2147483647, %v978_v50  ;;  %v1047_v63 = vand.u32 2147483647, %v983_v53 }
 0x1ea   : > { %v829_v11 = vpop.permute.xlu1 %828  ;;  %v817_v18 = vpop.permute.xlu0 %816  ;;  %v2556_v20 = vmul.f32 %v1974_v10, %v1495_v23 }
 0x1eb   : > { %v982_v47 = vsub.f32 %v829_v11, %v2445_v56  ;;  %v980_v1 = vsub.f32 %v817_v18, %v2450_v61  ;;  %v1161_v8 = vadd.f32 %v1043_v14, %v1042_v57 }
 0x1ed   : > { %v1976_v22 = vpop.eup %1975  ;;  %v1046_v3 = vand.u32 2147483647, %v982_v47  ;;  %v1044_v40 = vand.u32 2147483647, %v980_v1 }
 0x1ee   : > { %v797_v25 = vpop.permute.xlu1 %796  ;;  %v2558_v29 = vpop.permute.xlu0 %852  ;;  %v2560_v44 = vmul.f32 %v1976_v22, %v1494_v24 }
 0x1ef   : > { %v976_v15 = vsub.f32 %v797_v25, %v2450_v61  ;;  %v1171_v48 = vadd.f32 %v1047_v63, %v1046_v3 }
 0x1f1   : > { %v1040_v9 = vand.u32 2147483647, %v976_v15 }
 0x1f2   : > { %v2562_v0 = vpop.permute.xlu1 %848  ;;  %v821_v27 = vpop.permute.xlu0 %820 }
 0x1f3   : > { %v981_v58 = vsub.f32 %v821_v27, %v2457_v17  ;;  %v987_v27 = vsub.f32 %v2558_v29, %v2442_v55  ;;  %v1152_v50 = vadd.f32 %v2554_v45, %v1040_v9 }
 0x1f5   : > { %v1045_v23 = vand.u32 2147483647, %v981_v58 }
 0x1f6   : > { %v801_v30 = vpop.permute.xlu1 %800  ;;  %v2564_v26 = vpop.permute.xlu0 %868 }
 0x1f7   : > { %v977_v41 = vsub.f32 %v801_v30, %v2457_v17  ;;  %v986_v30 = vsub.f32 %v2562_v0, %v2445_v56  ;;  %v1163_v21 = vsel %vm1072_vm3, %v1045_v23, 0.0 }
 0x1f9   : > { %v1041_v11 = vand.u32 2147483647, %v977_v41  ;;  %v1050_v57 = vand.u32 2147483647, %v986_v30 }
 0x1fa   : > { %v837_v5 = vpop.permute.xlu1 %836  ;;  %v841_v28 = vpop.permute.xlu0 %840 }
 0x1fb   : > { %v984_v18 = vsub.f32 %v837_v5, %v2450_v61  ;;  %v985_v25 = vsub.f32 %v841_v28, %v2457_v17  ;;  %v1153_v5 = vsel %vm1072_vm3, %v1041_v11, 0.0  ;;  %v990_v28 = vsub.f32 %v2564_v26, %v2445_v56 }
 0x1fc   : > { %v2631_v58 = vadd.f32 %v1153_v5, %v1152_v50 }
 0x1fd   : > { %v1048_v53 = vand.u32 2147483647, %v984_v18  ;;  %v1049_v29 = vand.u32 2147483647, %v985_v25  ;;  %v1054_v26 = vand.u32 2147483647, %v990_v28 }
 0x1fe   : > { %v2566_v51 = vpop.permute.xlu1 %872  ;;  %v2568_v2 = vpop.permute.xlu0 %888 }
 0x1ff   : > { %v991_v0 = vsub.f32 %v2566_v51, %v2442_v55  ;;  %v1173_v41 = vsel %vm1072_vm3, %v1049_v29, 0.0  ;;  %v994_v51 = vsub.f32 %v2568_v2, %v2445_v56 }
 0x201   : > { %v1058_v18 = vand.u32 2147483647, %v994_v51 }
 0x202   : > { %v2570_v34 = vpop.permute.xlu1 %856  ;;  %v753_v36 = vpop.permute.xlu0 %752 }
 0x203   : > { %v967_v49 = vsub.f32 %v753_v36, %v2442_v55  ;;  %v988_v45 = vsub.f32 %v2570_v34, %v2450_v61 }
 0x205   : > { %v1031_v54 = vand.u32 2147483647, %v967_v49  ;;  %v1162_v49 = vadd.f32 %v1161_v8, %v1044_v40  ;;  %v1052_v63 = vand.u32 2147483647, %v988_v45 }
 0x206   : > { %v2572_v12 = vpop.permute.xlu1 %892  ;;  %v2574_v37 = vpop.permute.xlu0 %876 }
 0x207   : > { %v1131_v6 = vadd.f32 %v1031_v54, %v1030_v16  ;;  %v1051_v54 = vand.u32 2147483647, %v987_v27  ;;  %v2629_v15 = vadd.f32 %v1163_v21, %v1162_v49 }
 0x20a   : > { %v2576_v4 = vpop.permute.xlu1 %860  ;;  %v2578_v31 = vpop.permute.xlu0 %912 }
 0x20b   : > { %v999_v2 = vsub.f32 %v2578_v31, %v2442_v55 }
 0x20d   : > { %v1063_v49 = vand.u32 2147483647, %v999_v2 }
 0x20e   : > { %v2580_v38 = vpop.permute.xlu1 %908  ;;  %v2582_v19 = vpop.permute.xlu0 %772 }
 0x20f   : > { %v971_v31 = vsub.f32 %v2582_v19, %v2442_v55 }
 0x212   : > { %v2584_v42 = vpop.permute.xlu1 %768  ;;  %v2586_v13 = vpop.permute.xlu0 %896 }
 0x216   : > { %v2588_v46 = vpop.permute.xlu1 %880  ;;  %v2590_v32 = vpop.permute.xlu0 %932 }
 0x21a   : > { %v2595_v52 = vpop.permute.xlu1 %928  ;;  %v2597_v33 = vpop.permute.xlu0 %900 }
 0x21b   : > { %v997_v5 = vsub.f32 %v2597_v33, %v2457_v17 }
 0x21e   : > { %v757_v59 = vpop.permute.xlu1 %756  ;;  %v761_v60 = vpop.permute.xlu0 %760 }
 0x21f   : > { %v968_v39 = vsub.f32 %v757_v59, %v2450_v61  ;;  %v969_v62 = vsub.f32 %v761_v60, %v2457_v17  ;;  %v1172_v59 = vadd.f32 %v1171_v48, %v1048_v53  ;;  %v989_v60 = vsub.f32 %v2576_v4, %v2457_v17 }
 0x220   : > { %v995_v4 = vsub.f32 %v2572_v12, %v2442_v55  ;;  %v1003_v12 = vsub.f32 %v2590_v32, %v2442_v55  ;;  %v970_v48 = vsub.f32 %v2584_v42, %v2445_v56 }
 0x221   : > { %v1032_v43 = vand.u32 2147483647, %v968_v39  ;;  %v1033_v7 = vand.u32 2147483647, %v969_v62  ;;  %v1055_v39 = vand.u32 2147483647, %v991_v0  ;;  %v1181_v62 = vadd.f32 %v1051_v54, %v1050_v57 }
 0x222   : > { %v2609_v10 = vpop.permute.xlu1 %916  ;;  %v921_v8 = vpop.permute.xlu0 %920  ;;  %v1174_v40 = vadd.f32 %v1173_v41, %v1172_v59  ;;  %v1053_v9 = vand.u32 2147483647, %v989_v60  ;;  %v1059_v30 = vand.u32 2147483647, %v995_v4  ;;  %v1067_v19 = vand.u32 2147483647, %v1003_v12 }
 0x223   : > { %v1132_v24 = vadd.f32 %v1131_v6, %v1032_v43  ;;  %v1133_v22 = vsel %vm1072_vm3, %v1033_v7, 0.0  ;;  %v1165_v6 = vrot.slane %v2629_v15, 4  ;;  %v1155_v43 = vrot.slane %v2631_v58, 4 }
 0x224   : > { %v992_v7 = vsub.f32 %v2574_v37, %v2450_v61  ;;  %v1191_v11 = vadd.f32 %v1055_v39, %v1054_v26  ;;  %v1182_v25 = vadd.f32 %v1181_v62, %v1052_v63  ;;  %v1002_v37 = vsub.f32 %v2595_v52, %v2445_v56 }
 0x225   : > { %v1134_v36 = vadd.f32 %v1133_v22, %v1132_v24  ;;  %v998_v24 = vsub.f32 %v2580_v38, %v2445_v56  ;;  %v993_v22 = vsub.f32 %v2588_v46, %v2457_v17  ;;  %v1183_v38 = vsel %vm1072_vm3, %v1053_v9, 0.0 }
 0x226   : > { %v2621_v47 = vpop.permute.xlu1 %776  ;;  %v996_v46 = vsub.f32 %v2586_v13, %v2450_v61  ;;  %v1000_v55 = vsub.f32 %v2609_v10, %v2450_v61  ;;  %v781_v56 = vpop.permute.xlu0 %780  ;;  %v1066_v42 = vand.u32 2147483647, %v1002_v37  ;;  %v1001_v53 = vsub.f32 %v921_v8, %v2457_v17 }
 0x227   : > { %v1135_v14 = vrot.slane %v1134_v36, 4  ;;  %v1062_v52 = vand.u32 2147483647, %v998_v24  ;;  %v1057_v21 = vand.u32 2147483647, %v993_v22  ;;  %v1201_v0 = vadd.f32 %v1059_v30, %v1058_v18 }
 0x228   : > { %v1034_v28 = vand.u32 2147483647, %v970_v48  ;;  %v1060_v33 = vand.u32 2147483647, %v996_v46  ;;  %v973_v57 = vsub.f32 %v781_v56, %v2457_v17  ;;  %v1184_v10 = vadd.f32 %v1183_v38, %v1182_v25 }
 0x229   : > { %v1136_v1 = vadd.f32 %v1135_v14, %v1134_v36  ;;  %v1056_v36 = vand.u32 2147483647, %v992_v7  ;;  %v1035_v14 = vand.u32 2147483647, %v971_v31  ;;  %v1211_v45 = vadd.f32 %v1063_v49, %v1062_v52 }
 0x22a   : > { %v937_v3 = vpop.permute.xlu1 %936  ;;  %v1064_v59 = vand.u32 2147483647, %v1000_v55  ;;  %v1193_v60 = vsel %vm1072_vm3, %v1057_v21, 0.0  ;;  %v1065_v26 = vand.u32 2147483647, %v1001_v53  ;;  %v1175_v39 = vrot.slane %v1174_v40, 4 }
 0x22b   : > { %v1137_v16 = vrot.slane %v1136_v1, 2  ;;  %v1004_v13 = vsub.f32 %v937_v3, %v2450_v61  ;;  %v1192_v54 = vadd.f32 %v1191_v11, %v1056_v36  ;;  %v1141_v51 = vadd.f32 %v1035_v14, %v1034_v28 }
 0x22c   : > { %v1156_v63 = vadd.f32 %v1155_v43, %v2631_v58  ;;  %v1037_v3 = vand.u32 2147483647, %v973_v57  ;;  %v1212_v7 = vadd.f32 %v1211_v45, %v1064_v59  ;;  %v1185_v8 = vrot.slane %v1184_v10, 4 }
 0x22d   : > { %v1138_v34 = vadd.f32 %v1137_v16, %v1136_v1  ;;  %v1061_v1 = vand.u32 2147483647, %v997_v5  ;;  %v1221_v16 = vadd.f32 %v1067_v19, %v1066_v42  ;;  %v1068_v41 = vand.u32 2147483647, %v1004_v13 }
 0x22e   : > { %v941_v50 = vpop.permute.xlu1 %940  ;;  %v1213_v9 = vsel %vm1072_vm3, %v1065_v26, 0.0  ;;  %v1157_v22 = vrot.slane %v1156_v63, 2  ;;  %v1186_v43 = vadd.f32 %v1185_v8, %v1184_v10 }
 0x22f   : > { %v1139_v23 = vrot.slane %v1138_v34, 1  ;;  %v1005_v29 = vsub.f32 %v941_v50, %v2457_v17  ;;  %v1194_v17 = vadd.f32 %v1193_v60, %v1192_v54  ;;  %v1203_v4 = vsel %vm1072_vm3, %v1061_v1, 0.0 }
 0x230   : > { %v1222_v2 = vadd.f32 %v1221_v16, %v1068_v41  ;;  %v1158_v36 = vadd.f32 %v1157_v22, %v1156_v63 }
 0x231   : > { %v1140_v27 = vadd.f32 %v1139_v23, %v1138_v34  ;;  %v1202_v34 = vadd.f32 %v1201_v0, %v1060_v33  ;;  %v1176_v23 = vadd.f32 %v1175_v39, %v1174_v40  ;;  %v1195_v58 = vrot.slane %v1194_v17, 4 }
 0x232   : > { %v1187_v40 = vrot.slane %v1186_v43, 2  ;;  %v1159_v21 = vrot.slane %v1158_v36, 1 }
 0x233   : > { %v2663_v32 = vsel %vm1542_vm9, %v1140_v27, %v2544_v35  ;;  %v972_v35 = vsub.f32 %v2621_v47, %v2450_v61  ;;  %v1069_v61 = vand.u32 2147483647, %v1005_v29  ;;  %v1166_v47 = vadd.f32 %v1165_v6, %v2629_v15 }
 0x234   : > { %v1204_v25 = vadd.f32 %v1203_v4, %v1202_v34  ;;  %v1143_v15 = vsel %vm1072_vm3, %v1037_v3, 0.0  ;;  %v1214_v6 = vadd.f32 %v1213_v9, %v1212_v7  ;;  %v1177_v37 = vrot.slane %v1176_v23, 2 }
 0x235   : > { %v1036_v62 = vand.u32 2147483647, %v972_v35  ;;  %v1223_v18 = vsel %vm1072_vm3, %v1069_v61, 0.0  ;;  %v1167_v24 = vrot.slane %v1166_v47, 2  ;;  %v1196_v48 = vadd.f32 %v1195_v58, %v1194_v17 }
 0x236   : > { %v1224_v12 = vadd.f32 %v1223_v18, %v1222_v2  ;;  %v1205_v31 = vrot.slane %v1204_v25, 4  ;;  %v1215_v38 = vrot.slane %v1214_v6, 4  ;;  %v1178_v46 = vadd.f32 %v1177_v37, %v1176_v23 }
 0x237   : > { %v1142_v11 = vadd.f32 %v1141_v51, %v1036_v62  ;;  %v1168_v30 = vadd.f32 %v1167_v24, %v1166_v47  ;;  %v1197_v55 = vrot.slane %v1196_v48, 2  ;;  %v1188_v19 = vadd.f32 %v1187_v40, %v1186_v43 }
 0x238   : > { %v1225_v49 = vrot.slane %v1224_v12, 4  ;;  %v1206_v5 = vadd.f32 %v1205_v31, %v1204_v25  ;;  %v1216_v56 = vadd.f32 %v1215_v38, %v1214_v6  ;;  %v1179_v53 = vrot.slane %v1178_v46, 1 }
 0x239   : > { %v1144_v27 = vadd.f32 %v1143_v15, %v1142_v11  ;;  %v1169_v52 = vrot.slane %v1168_v30, 1  ;;  %v1160_v28 = vadd.f32 %v1159_v21, %v1158_v36  ;;  %v1198_v29 = vadd.f32 %v1197_v55, %v1196_v48 }
 0x23a   : > { %v1226_v42 = vadd.f32 %v1225_v49, %v1224_v12  ;;  %v1207_v35 = vrot.slane %v1206_v5, 2  ;;  %v1217_v0 = vrot.slane %v1216_v56, 2  ;;  %v1189_v54 = vrot.slane %v1188_v19, 1 }
 0x23b   : > { %v1145_v50 = vrot.slane %v1144_v27, 4  ;;  %v1170_v14 = vadd.f32 %v1169_v52, %v1168_v30  ;;  %v1180_v57 = vadd.f32 %v1179_v53, %v1178_v46  ;;  %v1199_v59 = vrot.slane %v1198_v29, 1 }
 0x23c   : > { %v1227_v33 = vrot.slane %v1226_v42, 2  ;;  %v1208_v1 = vadd.f32 %v1207_v35, %v1206_v5  ;;  %v1218_v60 = vadd.f32 %v1217_v0, %v1216_v56  ;;  %v1190_v16 = vadd.f32 %v1189_v54, %v1188_v19 }
 0x23d   : > { %v1146_v13 = vadd.f32 %v1145_v50, %v1144_v27  ;;  %v1546_v45 = vsel %vm1532_vm4, %v1170_v14, %v1160_v28  ;;  %v1200_v62 = vadd.f32 %v1199_v59, %v1198_v29  ;;  %v1511_v25 = vsub.f32 1.0, %v2556_v20 }
 0x23e   : > { %v1228_v26 = vadd.f32 %v1227_v33, %v1226_v42  ;;  %v1547_v41 = vsel %vm1534_vm5, %v1180_v57, %v1546_v45  ;;  %v1209_v51 = vrot.slane %v1208_v1, 1  ;;  %v1219_v61 = vrot.slane %v1218_v60, 1 }
 0x23f   : > { %v1147_v10 = vrot.slane %v1146_v13, 2  ;;  %v1548_v63 = vsel %vm1536_vm6, %v1190_v16, %v1547_v41  ;;  %v1510_v6 = vsub.f32 1.0, %v2560_v44 }
 0x240   : > { %v1229_v47 = vrot.slane %v1228_v26, 1  ;;  %v1210_v3 = vadd.f32 %v1209_v51, %v1208_v1  ;;  %v1220_v17 = vadd.f32 %v1219_v61, %v1218_v60  ;;  %v1549_v4 = vsel %vm1538_vm7, %v1200_v62, %v1548_v63 }
 0x241   : > { %v1148_v39 = vadd.f32 %v1147_v10, %v1146_v13 }
 0x242   : > { %v1230_v7 = vadd.f32 %v1229_v47, %v1228_v26  ;;  %v1550_v2 = vsel %vm1540_vm8, %v1210_v3, %v1549_v4 }
 0x243   : > { %v1149_v34 = vrot.slane %v1148_v39, 1  ;;  %v1551_v11 = vsel %vm1542_vm9, %v1220_v17, %v1550_v2 }
 0x244   : > { %v1552_v24 = vsel %vm1544_vm10, %v1230_v7, %v1551_v11 }
 0x245   : > { %v1150_v8 = vadd.f32 %v1149_v34, %v1148_v39 }
 0x247   : > { %v1545_v58 = vsel %vm1544_vm10, %v1150_v8, %v2663_v32 }
 0x25b   : > { %v1863_v9 = vpop.f32.mrb[0].mxu0 }
 0x25c   : > { %v617_v23 = vsub.f32 0.0, %v1863_v9  ;;  %v607_v18 = vpop.f32.mrb[1].mxu0 }
 0x25d   : > { %v616_v22 = vsub.f32 0.0, %v607_v18 }
 0x25e   : > { %v1556_v15 = vadd.f32 %v1552_v24, %v617_v23 }
 0x25f   : > { %v1555_v43 = vadd.f32 %v1545_v58, %v616_v22 }
 0x260   : > { %v1558_v12 = vadd.f32 %v1556_v15, %v1511_v25 }
 0x261   : > { %v1557_v37 = vadd.f32 %v1555_v43, %v1510_v6 }
 0x27b   : > { %v1853_v27 = vpop.f32.mrb[4].mxu0 }
 0x27c   : > { %v1854_v30 = vpop.f32.mrb[5].mxu0 }
 0x27d   : > { %v1855_v36 = vadd.f32 %v1854_v30, %v1853_v27  ;;  %v1856_v31 = vpop.f32.mrb[6].mxu0 }
 0x27e   : > { %v1857_v48 = vpop.f32.mrb[7].mxu0 }
 0x27f   : > { %v1512_v38 = vmul.f32 0.1, %v1855_v36  ;;  %v1858_v40 = vadd.f32 %v1857_v48, %v1856_v31 }
 0x281   : > { %v1514_v20 = vsub.f32 1.0, %v1512_v38  ;;  %v1513_v32 = vmul.f32 0.1, %v1858_v40 }
 0x283   : > { %v1559_v44 = vadd.f32 %v1557_v37, %v1514_v20  ;;  %v1515_v49 = vsub.f32 1.0, %v1513_v32 }
 0x285   : > { %1561 = vst [vmem:[%s431_s23] sm:$0xff] %v1559_v44  ;;  %v1560_v46 = vadd.f32 %v1558_v12, %v1515_v49 }
 0x287   : > { %1562 = vst [vmem:[%s431_s23 + $0x8] sm:$0xff] %v1560_v46 }
 0x288   : > { %2020 = shalt.err (!%p2017_p4)
}
 0x289   : > { %s2021_s17 = scalar_lea.hbm %s2698_s13, 256  ;;  %s2025_s10 = scalar_lea.hbm %s2754_s7, 512 }
 0x28a   : > { %p2022_p7 = scmp.ne.s32.totalorder %s2698_s13, %s2021_s17  ;;  %p2026_p1 = scmp.lt.u32.totalorder %s2698_s13, %s2754_s7 }
 0x28b   : > { %p2027_p3 = scmp.lt.u32.totalorder %s2025_s10, %s2021_s17  ;;  %p2029_p8 = scmp.lt.u32.totalorder %s2021_s17, %s2698_s13 }
 0x28c   : > { %p2023_p10 = pnand %p2022_p7, %p2762_p11 }
 0x28d   : > { %p2028_p9 = por %p2027_p3, %p2026_p1 }
 0x28e   : > { %p2024_p12 = pneg %p2023_p10 }
 0x28f   : > { %p2030_p0 = por %p2029_p8, %p2028_p9 }
 0x291   : > { %p2031_p6 = pnand %p2030_p0, %p2024_p12 }
 0x293   : > { %2034 = shalt.err (!%p2031_p6)
}
 0x294   : > { %s2095_s12 = smov 128   ;;  %s2096_s27 = smov 8  }
 0x295   : > { %1866 = dma.vmem_to_hbm [thread:$0]  (%p2762_p11), %s2693_s8, 256, %s2698_s13, %s1564_s19, %s2095_s12, %s2095_s12, %s2096_s27  }
 0x296 PF: > { %s1594_s11 = sand.u32 1, %s2069_s24   ;;  %p2763_p13 = scmp.ne.s32.totalorder %s2759_s16, 0 }
 0x297   : > { %p2764_p2 = scmp.ge.s32.totalorder %s2089_s29, 2  ;;  %s1595_s21 = scalar_lea.sflag [#allocation4], %s1594_s11 }
 0x299   : > { %p1873_p5 = pnand %p2764_p2, %p2763_p13 }
 0x29b   : > { %2064 = dma.done.wait (!%p1873_p5), %s1595_s21, 256  }
 0x29c   : > { %2066 = vsyncadd (!%p1873_p5), %s1595_s21, 4294967040  ;;  %s23_s29 = sadd.s32 1, %s2089_s29   ;;  %s2765_s24 = smov %s2073_s25 }
 0x29d   : > { %p20_p4 = scmp.ge.s32.totalorder %s23_s29, 4   ;;  %s2766_s25 = smov %s2077_s26 }
 0x29e   : > { %s2767_s26 = smov %s2193_s15  ;;  %s2768_s27 = smov %s2085_s28 }
 0x29f   : > { %s2769_s28 = smov %s2771_s9  ;;  %22 = sbr.rel (!%p20_p4) target bundleno = 6 (0x6), region = 111 }
 0x2a6   :  { %1600 = vsyncpa [#allocation3], 1 }
 0x2a7   :  { %1602 = vsyncpa [#allocation3 + $0x1], 1 }
 0x2a8   :  { %1603 = vsyncpa [#allocation4], 1 }
 0x2a9   :  { %1605 = vsyncpa [#allocation4 + $0x1], 1 }

</bundles_post_ra>
